<compile_context>
chip_gen: v5e
topology: v5e:2x2
jax: 0.10.0
libtpu: 0.0.40
codegen_flags: <defaults>
</compile_context>

<pallas_src>
import functools
import math

import jax
import jax.numpy as jnp
from jax.experimental import pallas as pl
from jax.experimental.pallas import tpu as pltpu

LN_EPS = 1e-5


# ------------------------------ Pallas kernel ------------------------------ #

def _te_layer_kernel(x_ref, posqk_ref, wqkv_ref, bqkv_ref, wo_ref, bo_ref,
                     g1_ref, be1_ref, w1_ref, b1_ref, w2_ref, b2_ref,
                     g2_ref, be2_ref, o_ref, attn_sc,
                     *, nhead, scale, eps):
    """Full TELayer (attention + LN1 + FFN + LN2) for one batch block."""
    Bb, S, E = x_ref.shape
    dh = E // nhead
    M = Bb * S

    x = x_ref[...]                                  # (Bb, S, E) f32
    x2d = x.reshape(M, E)
    x16 = x2d.astype(jnp.bfloat16)

    # Fused Q/K/V projection: one (E, 3E) MXU dot with M = Bb*S rows.
    proj = jnp.dot(x16, wqkv_ref[...],
                   preferred_element_type=jnp.float32) + bqkv_ref[...]
    qk = proj[:, :2 * E].reshape(Bb, S, 2 * E) + posqk_ref[...]   # + pos @ Wqk
    v16 = proj[:, 2 * E:].reshape(Bb, S, E).astype(jnp.bfloat16)
    q16 = (qk[..., :E] * scale).astype(jnp.bfloat16)   # fold 1/sqrt(dh) into q
    k16 = qk[..., E:].astype(jnp.bfloat16)

    # Per-head scaled-dot-product attention; each head's output is written
    # straight into the VMEM scratch (lane-aligned slice, no concat).
    for h in range(nhead):                            # static, small nhead
        sl = slice(h * dh, (h + 1) * dh)
        s = jnp.einsum('bqd,bkd->bqk', q16[..., sl], k16[..., sl],
                       preferred_element_type=jnp.float32)
        s = s - jnp.max(s, axis=-1, keepdims=True)
        p = jnp.exp(s)
        inv = pl.reciprocal(jnp.sum(p, axis=-1, keepdims=True), approx=True)
        p16 = (p * inv).astype(jnp.bfloat16)
        attn_sc[:, :, sl] = jnp.einsum('bqk,bkd->bqd', p16, v16[..., sl],
                                       preferred_element_type=jnp.float32)

    # Output projection + residual + LayerNorm1.
    attn = jnp.dot(attn_sc[...].reshape(M, E).astype(jnp.bfloat16), wo_ref[...],
                   preferred_element_type=jnp.float32) + bo_ref[...]
    y = x2d + attn                                   # dropout1 = identity
    mu = jnp.mean(y, axis=-1, keepdims=True)
    var = jnp.mean((y - mu) ** 2, axis=-1, keepdims=True)
    yn = (y - mu) * jax.lax.rsqrt(var + eps) * g1_ref[...] + be1_ref[...]

    # Feed-forward + residual + LayerNorm2 (fused; dropout/dropout2 = identity)
    h1 = jnp.dot(yn.astype(jnp.bfloat16), w1_ref[...],
                 preferred_element_type=jnp.float32) + b1_ref[...]
    h1 = jnp.maximum(h1, 0.0)                        # ReLU
    z = jnp.dot(h1.astype(jnp.bfloat16), w2_ref[...],
                preferred_element_type=jnp.float32) + b2_ref[...]
    y2 = yn + z
    mu2 = jnp.mean(y2, axis=-1, keepdims=True)
    var2 = jnp.mean((y2 - mu2) ** 2, axis=-1, keepdims=True)
    out = (y2 - mu2) * jax.lax.rsqrt(var2 + eps) * g2_ref[...] + be2_ref[...]
    o_ref[...] = out.reshape(Bb, S, E)


# -------------------------------- wrapper ----------------------------------- #

def _batch_block(B, S, *, row_target=256, row_cap=1024):
    """Batch elements per grid step: fill the MXU M dim (target 256 rows)."""
    if S % 8 != 0:                 # keep in-kernel (Bb*S, E) reshape tile-aligned
        return 1
    divs = [d for d in range(1, B + 1) if B % d == 0 and d * S <= row_cap]
    if not divs:
        return 1
    for d in divs:                 # smallest divisor reaching the row target
        if d * S >= row_target:
            return d
    return divs[-1]                # otherwise the largest one under the cap


def te_layer_forward(x, pos_embed, params, *, nhead):
    """TELayer.forward in eval mode.  x: (B, S, E); pos_embed: (S, E) or None."""
    (Wqk, bqk, Wv, bv, Wo, bo, g1, be1, W1, b1, W2, b2, g2, be2) = params
    B, S, E = x.shape
    F = W1.shape[1]
    assert E % nhead == 0
    if pos_embed is None:
        pos_embed = jnp.zeros((S, E), jnp.float32)

    # One-time (per call) parameter prep: fused QKV weight, bf16 weight copies,
    # and the positional contribution to the Q/K halves (tiny (S,2E) matmul).
    Wqkv_h = jnp.concatenate([Wqk, Wv], axis=1).astype(jnp.bfloat16)   # (E, 3E)
    bqkv = jnp.concatenate([bqk, bv], axis=1)                          # (1, 3E)
    posqk = pos_embed @ Wqk                                            # (S, 2E)
    Wo_h = Wo.astype(jnp.bfloat16)
    W1_h = W1.astype(jnp.bfloat16)
    W2_h = W2.astype(jnp.bfloat16)

    scale = 1.0 / math.sqrt(E // nhead)
    Bb = _batch_block(B, S)
    const = lambda b: (0, 0)

    # TODO(synk): for much larger E/F the resident W1/W2 blocks should be
    # single-buffered or streamed over an F grid axis with an explicit
    # vmem_limit_bytes; not needed at these shapes.
    out = pl.pallas_call(
        functools.partial(_te_layer_kernel, nhead=nhead, scale=scale,
                          eps=LN_EPS),
        out_shape=jax.ShapeDtypeStruct((B, S, E), jnp.float32),
        grid=(B // Bb,),
        in_specs=[
            pl.BlockSpec((Bb, S, E), lambda b: (b, 0, 0)),   # x
            pl.BlockSpec((S, 2 * E), const),                 # pos @ Wqk
            pl.BlockSpec((E, 3 * E), const),                 # Wqkv (bf16)
            pl.BlockSpec((1, 3 * E), const),                 # bqkv
            pl.BlockSpec((E, E), const),                     # Wo (bf16)
            pl.BlockSpec((1, E), const),                     # bo
            pl.BlockSpec((1, E), const),                     # gamma1
            pl.BlockSpec((1, E), const),                     # beta1
            pl.BlockSpec((E, F), const),                     # W1 (bf16)
            pl.BlockSpec((1, F), const),                     # b1
            pl.BlockSpec((F, E), const),                     # W2 (bf16)
            pl.BlockSpec((1, E), const),                     # b2
            pl.BlockSpec((1, E), const),                     # gamma2
            pl.BlockSpec((1, E), const),                     # beta2
        ],
        out_specs=pl.BlockSpec((Bb, S, E), lambda b: (b, 0, 0)),
        scratch_shapes=[pltpu.VMEM((Bb, S, E), jnp.float32)],
        compiler_params=pltpu.CompilerParams(
            dimension_semantics=("parallel",)),
    )(x, posqk, Wqkv_h, bqkv, Wo_h, bo, g1, be1, W1_h, b1, W2_h, b2, g2, be2)
    return out


# -------------------------- pure-JAX reference ------------------------------ #

def _layer_norm(x, g, b, eps=LN_EPS):
    mu = jnp.mean(x, axis=-1, keepdims=True)
    var = jnp.mean((x - mu) ** 2, axis=-1, keepdims=True)
    return (x - mu) * jax.lax.rsqrt(var + eps) * g + b


def _ref_forward(x, pos_embed, params, *, nhead):
    (Wqk, bqk, Wv, bv, Wo, bo, g1, be1, W1, b1, W2, b2, g2, be2) = params
    B, S, E = x.shape
    dh = E // nhead
    qk = x + pos_embed[None]
    Wq, Wk = Wqk[:, :E], Wqk[:, E:]
    bq, bk = bqk[:, :E], bqk[:, E:]
    q = qk @ Wq + bq
    k = qk @ Wk + bk
    v = x @ Wv + bv

    def split(t):
        return t.reshape(B, S, nhead, dh).transpose(0, 2, 1, 3)

    qh, kh, vh = split(q), split(k), split(v)
    s = jnp.einsum("bhqd,bhkd->bhqk", qh, kh) / math.sqrt(dh)
    p = jax.nn.softmax(s, axis=-1)
    a = jnp.einsum("bhqk,bhkd->bhqd", p, vh)
    a = a.transpose(0, 2, 1, 3).reshape(B, S, E) @ Wo + bo
    y = _layer_norm(x + a, g1, be1)
    h = jnp.maximum(y @ W1 + b1, 0.0)
    z = h @ W2 + b2
    return _layer_norm(y + z, g2, be2)


# ---------------------------- parameter init -------------------------------- #

def init_params(key, E, F, nhead):
    ks = jax.random.split(key, 12)

    def xavier(k, fi, fo):
        return math.sqrt(2.0 / (fi + fo)) * jax.random.normal(
            k, (fi, fo), jnp.float32)

    Wq, Wk, Wv = xavier(ks[0], E, E), xavier(ks[1], E, E), xavier(ks[2], E, E)
    Wqk = jnp.concatenate([Wq, Wk], axis=1)              # (E, 2E)
    bqk = 0.01 * jax.random.normal(ks[3], (1, 2 * E), jnp.float32)
    bv = 0.01 * jax.random.normal(ks[4], (1, E), jnp.float32)
    Wo = xavier(ks[5], E, E)
    bo = 0.01 * jax.random.normal(ks[6], (1, E), jnp.float32)
    g1 = jnp.ones((1, E), jnp.float32)
    be1 = jnp.zeros((1, E), jnp.float32)
    W1 = xavier(ks[7], E, F)
    b1 = 0.01 * jax.random.normal(ks[8], (1, F), jnp.float32)
    W2 = xavier(ks[9], F, E)
    b2 = 0.01 * jax.random.normal(ks[10], (1, E), jnp.float32)
    g2 = jnp.ones((1, E), jnp.float32)
    be2 = jnp.zeros((1, E), jnp.float32)
    return (Wqk, bqk, Wv, bv, Wo, bo, g1, be1, W1, b1, W2, b2, g2, be2)


# --------------------------------- main -------------------------------------- #

if __name__ == "__main__":
    # TODO(synk): dropout / dropout1 / dropout2 run in eval mode (identity);
    # the `pos` module is modeled as an additive learned positional embedding
    # (pos(x) = x + P); the unused attention-weight tensor returned by
    # nn.MultiheadAttention is not materialized.
    emb_dim, nhead, dim_forward = 256, 2, 512
    batch, seq = 2, 8

    key = jax.random.PRNGKey(0)
    kx, kpos, kp = jax.random.split(key, 3)
    x = jax.random.normal(kx, (batch, seq, emb_dim), jnp.float32)
    pos_embed = 0.02 * jax.random.normal(kpos, (seq, emb_dim), jnp.float32)
    params = init_params(kp, emb_dim, dim_forward, nhead)

    out = te_layer_forward(x, pos_embed, params, nhead=nhead)
    out = jax.block_until_ready(out)
    assert out.shape == (batch, seq, emb_dim), out.shape

    ref = _ref_forward(x, pos_embed, params, nhead=nhead)
    err = float(jnp.max(jnp.abs(out - ref)))
    # bf16 operands on every MXU dot (projections, scores, P@V, FFN) with f32
    # accumulation -> small but nonzero error vs the f32 reference.
    assert err < 5e-2, f"max abs err {err}"

    print("KERNEL_OK")
</pallas_src>

<mosaic_0001>
module attributes {stable_mosaic.version = 11 : i64} {
  func.func @_te_layer_kernel(%arg0: i32, %arg1: memref<2x8x256xf32, #tpu.memory_space<vmem>>, %arg2: memref<8x512xf32, #tpu.memory_space<vmem>>, %arg3: memref<256x768xbf16, #tpu.memory_space<vmem>>, %arg4: memref<1x768xf32, #tpu.memory_space<vmem>>, %arg5: memref<256x256xbf16, #tpu.memory_space<vmem>>, %arg6: memref<1x256xf32, #tpu.memory_space<vmem>>, %arg7: memref<1x256xf32, #tpu.memory_space<vmem>>, %arg8: memref<1x256xf32, #tpu.memory_space<vmem>>, %arg9: memref<256x512xbf16, #tpu.memory_space<vmem>>, %arg10: memref<1x512xf32, #tpu.memory_space<vmem>>, %arg11: memref<512x256xbf16, #tpu.memory_space<vmem>>, %arg12: memref<1x256xf32, #tpu.memory_space<vmem>>, %arg13: memref<1x256xf32, #tpu.memory_space<vmem>>, %arg14: memref<1x256xf32, #tpu.memory_space<vmem>>, %arg15: memref<2x8x256xf32, #tpu.memory_space<vmem>>, %arg16: memref<2x8x256xf32, #tpu.memory_space<vmem>>) attributes {dimension_semantics = [#tpu.dimension_semantics<parallel>], iteration_bounds = array<i64: 1>, scalar_prefetch = 0 : i64, scratch_operands = 1 : i64, tpu.core_type = #tpu.core_type<tc>, window_params = [{transform_indices = @transform_0, window_bounds = array<i64: 2, 8, 256>}, {pipeline_mode = #tpu.pipeline_mode<synchronous>, transform_indices = @transform_1, window_bounds = array<i64: 8, 512>}, {pipeline_mode = #tpu.pipeline_mode<synchronous>, transform_indices = @transform_2, window_bounds = array<i64: 256, 768>}, {pipeline_mode = #tpu.pipeline_mode<synchronous>, transform_indices = @transform_3, window_bounds = array<i64: 1, 768>}, {pipeline_mode = #tpu.pipeline_mode<synchronous>, transform_indices = @transform_4, window_bounds = array<i64: 256, 256>}, {pipeline_mode = #tpu.pipeline_mode<synchronous>, transform_indices = @transform_5, window_bounds = array<i64: 1, 256>}, {pipeline_mode = #tpu.pipeline_mode<synchronous>, transform_indices = @transform_6, window_bounds = array<i64: 1, 256>}, {pipeline_mode = #tpu.pipeline_mode<synchronous>, transform_indices = @transform_7, window_bounds = array<i64: 1, 256>}, {pipeline_mode = #tpu.pipeline_mode<synchronous>, transform_indices = @transform_8, window_bounds = array<i64: 256, 512>}, {pipeline_mode = #tpu.pipeline_mode<synchronous>, transform_indices = @transform_9, window_bounds = array<i64: 1, 512>}, {pipeline_mode = #tpu.pipeline_mode<synchronous>, transform_indices = @transform_10, window_bounds = array<i64: 512, 256>}, {pipeline_mode = #tpu.pipeline_mode<synchronous>, transform_indices = @transform_11, window_bounds = array<i64: 1, 256>}, {pipeline_mode = #tpu.pipeline_mode<synchronous>, transform_indices = @transform_12, window_bounds = array<i64: 1, 256>}, {pipeline_mode = #tpu.pipeline_mode<synchronous>, transform_indices = @transform_13, window_bounds = array<i64: 1, 256>}, {transform_indices = @transform_14, window_bounds = array<i64: 2, 8, 256>}]} {
    %c0 = arith.constant 0 : index
    %c0_0 = arith.constant 0 : index
    %c0_1 = arith.constant 0 : index
    %0 = vector.load %arg1[%c0, %c0_0, %c0_1] : memref<2x8x256xf32, #tpu.memory_space<vmem>>, vector<2x8x256xf32>
    %1 = vector.shape_cast %0 : vector<2x8x256xf32> to vector<16x256xf32>
    %2 = arith.truncf %1 : vector<16x256xf32> to vector<16x256xbf16>
    %c0_2 = arith.constant 0 : index
    %c0_3 = arith.constant 0 : index
    %3 = vector.load %arg3[%c0_2, %c0_3] : memref<256x768xbf16, #tpu.memory_space<vmem>>, vector<256x768xbf16>
    %cst = arith.constant dense<0.000000e+00> : vector<16x768xf32>
    %4 = tpu.matmul %2, %3, %cst {dimension_numbers = #tpu.dot_dimension_numbers<[1], [0], [0], [1], [0, 0, 1, 1], [], []>} : vector<16x256xbf16>, vector<256x768xbf16>, vector<16x768xf32> -> vector<16x768xf32>
    %c0_4 = arith.constant 0 : index
    %c0_5 = arith.constant 0 : index
    %5 = vector.load %arg4[%c0_4, %c0_5] : memref<1x768xf32, #tpu.memory_space<vmem>>, vector<1x768xf32>
    %6 = vector.broadcast %5 : vector<1x768xf32> to vector<16x768xf32>
    %7 = arith.addf %4, %6 : vector<16x768xf32>
    %8 = vector.extract_strided_slice %7 {offsets = [0, 0], sizes = [16, 512], strides = [1, 1]} : vector<16x768xf32> to vector<16x512xf32>
    %9 = vector.shape_cast %8 : vector<16x512xf32> to vector<2x8x512xf32>
    %c0_6 = arith.constant 0 : index
    %c0_7 = arith.constant 0 : index
    %10 = vector.load %arg2[%c0_6, %c0_7] : memref<8x512xf32, #tpu.memory_space<vmem>>, vector<8x512xf32>
    %11 = vector.shape_cast %10 : vector<8x512xf32> to vector<1x8x512xf32>
    %12 = vector.broadcast %11 : vector<1x8x512xf32> to vector<2x8x512xf32>
    %13 = arith.addf %9, %12 : vector<2x8x512xf32>
    %14 = vector.extract_strided_slice %7 {offsets = [0, 512], sizes = [16, 256], strides = [1, 1]} : vector<16x768xf32> to vector<16x256xf32>
    %15 = vector.shape_cast %14 : vector<16x256xf32> to vector<2x8x256xf32>
    %16 = arith.truncf %15 : vector<2x8x256xf32> to vector<2x8x256xbf16>
    %17 = vector.extract_strided_slice %13 {offsets = [0, 0, 0], sizes = [2, 8, 256], strides = [1, 1, 1]} : vector<2x8x512xf32> to vector<2x8x256xf32>
    %cst_8 = arith.constant 0.0883883461 : f32
    %18 = vector.broadcast %cst_8 : f32 to vector<2x8x256xf32>
    %19 = arith.mulf %17, %18 : vector<2x8x256xf32>
    %20 = arith.truncf %19 : vector<2x8x256xf32> to vector<2x8x256xbf16>
    %21 = vector.extract_strided_slice %13 {offsets = [0, 0, 256], sizes = [2, 8, 256], strides = [1, 1, 1]} : vector<2x8x512xf32> to vector<2x8x256xf32>
    %22 = arith.truncf %21 : vector<2x8x256xf32> to vector<2x8x256xbf16>
    %23 = vector.extract_strided_slice %20 {offsets = [0, 0, 0], sizes = [2, 8, 128], strides = [1, 1, 1]} : vector<2x8x256xbf16> to vector<2x8x128xbf16>
    %24 = vector.extract_strided_slice %22 {offsets = [0, 0, 0], sizes = [2, 8, 128], strides = [1, 1, 1]} : vector<2x8x256xbf16> to vector<2x8x128xbf16>
    "tpu.trace_start"() <{level = 10 : i32, message = "bqd,bkd->bqk"}> : () -> ()
    %cst_9 = arith.constant dense<0.000000e+00> : vector<2x8x8xf32>
    %25 = tpu.matmul %23, %24, %cst_9 {dimension_numbers = #tpu.dot_dimension_numbers<[2], [2], [1], [1], [0, 0, 0, 1, 1, 1], [0], [0]>} : vector<2x8x128xbf16>, vector<2x8x128xbf16>, vector<2x8x8xf32> -> vector<2x8x8xf32>
    "tpu.trace_stop"() : () -> ()
    %cst_10 = arith.constant dense<0xFF800000> : vector<2x8xf32>
    %26 = vector.multi_reduction <maximumf>, %25, %cst_10 [2] : vector<2x8x8xf32> to vector<2x8xf32>
    %27 = vector.shape_cast %26 : vector<2x8xf32> to vector<2x8x1xf32>
    %28 = vector.broadcast %27 : vector<2x8x1xf32> to vector<2x8x8xf32>
    %29 = arith.subf %25, %28 : vector<2x8x8xf32>
    %30 = math.exp %29 : vector<2x8x8xf32>
    %cst_11 = arith.constant dense<0.000000e+00> : vector<2x8xf32>
    %31 = vector.multi_reduction <add>, %30, %cst_11 [2] : vector<2x8x8xf32> to vector<2x8xf32>
    %32 = vector.shape_cast %31 : vector<2x8xf32> to vector<2x8x1xf32>
    %33 = tpu.reciprocal %32 {approx = true} : vector<2x8x1xf32> -> vector<2x8x1xf32>
    %34 = vector.broadcast %33 : vector<2x8x1xf32> to vector<2x8x8xf32>
    %35 = arith.mulf %30, %34 : vector<2x8x8xf32>
    %36 = arith.truncf %35 : vector<2x8x8xf32> to vector<2x8x8xbf16>
    %37 = vector.extract_strided_slice %16 {offsets = [0, 0, 0], sizes = [2, 8, 128], strides = [1, 1, 1]} : vector<2x8x256xbf16> to vector<2x8x128xbf16>
    "tpu.trace_start"() <{level = 10 : i32, message = "bqk,bkd->bqd"}> : () -> ()
    %cst_12 = arith.constant dense<0.000000e+00> : vector<2x8x128xf32>
    %38 = tpu.matmul %36, %37, %cst_12 {dimension_numbers = #tpu.dot_dimension_numbers<[2], [1], [1], [2], [0, 0, 0, 1, 1, 2], [0], [0]>} : vector<2x8x8xbf16>, vector<2x8x128xbf16>, vector<2x8x128xf32> -> vector<2x8x128xf32>
    "tpu.trace_stop"() : () -> ()
    %c0_13 = arith.constant 0 : index
    %c0_14 = arith.constant 0 : index
    %c0_15 = arith.constant 0 : index
    %39 = vector.load %arg16[%c0_13, %c0_14, %c0_15] : memref<2x8x256xf32, #tpu.memory_space<vmem>>, vector<2x8x128xf32>
    tpu.vector_store %arg16[%c0_13, %c0_14, %c0_15], %38 {strides = array<i32>} : memref<2x8x256xf32, #tpu.memory_space<vmem>>, vector<2x8x128xf32>,
    %40 = vector.extract_strided_slice %20 {offsets = [0, 0, 128], sizes = [2, 8, 128], strides = [1, 1, 1]} : vector<2x8x256xbf16> to vector<2x8x128xbf16>
    %41 = vector.extract_strided_slice %22 {offsets = [0, 0, 128], sizes = [2, 8, 128], strides = [1, 1, 1]} : vector<2x8x256xbf16> to vector<2x8x128xbf16>
    "tpu.trace_start"() <{level = 10 : i32, message = "bqd,bkd->bqk"}> : () -> ()
    %cst_16 = arith.constant dense<0.000000e+00> : vector<2x8x8xf32>
    %42 = tpu.matmul %40, %41, %cst_16 {dimension_numbers = #tpu.dot_dimension_numbers<[2], [2], [1], [1], [0, 0, 0, 1, 1, 1], [0], [0]>} : vector<2x8x128xbf16>, vector<2x8x128xbf16>, vector<2x8x8xf32> -> vector<2x8x8xf32>
    "tpu.trace_stop"() : () -> ()
    %cst_17 = arith.constant dense<0xFF800000> : vector<2x8xf32>
    %43 = vector.multi_reduction <maximumf>, %42, %cst_17 [2] : vector<2x8x8xf32> to vector<2x8xf32>
    %44 = vector.shape_cast %43 : vector<2x8xf32> to vector<2x8x1xf32>
    %45 = vector.broadcast %44 : vector<2x8x1xf32> to vector<2x8x8xf32>
    %46 = arith.subf %42, %45 : vector<2x8x8xf32>
    %47 = math.exp %46 : vector<2x8x8xf32>
    %cst_18 = arith.constant dense<0.000000e+00> : vector<2x8xf32>
    %48 = vector.multi_reduction <add>, %47, %cst_18 [2] : vector<2x8x8xf32> to vector<2x8xf32>
    %49 = vector.shape_cast %48 : vector<2x8xf32> to vector<2x8x1xf32>
    %50 = tpu.reciprocal %49 {approx = true} : vector<2x8x1xf32> -> vector<2x8x1xf32>
    %51 = vector.broadcast %50 : vector<2x8x1xf32> to vector<2x8x8xf32>
    %52 = arith.mulf %47, %51 : vector<2x8x8xf32>
    %53 = arith.truncf %52 : vector<2x8x8xf32> to vector<2x8x8xbf16>
    %54 = vector.extract_strided_slice %16 {offsets = [0, 0, 128], sizes = [2, 8, 128], strides = [1, 1, 1]} : vector<2x8x256xbf16> to vector<2x8x128xbf16>
    "tpu.trace_start"() <{level = 10 : i32, message = "bqk,bkd->bqd"}> : () -> ()
    %cst_19 = arith.constant dense<0.000000e+00> : vector<2x8x128xf32>
    %55 = tpu.matmul %53, %54, %cst_19 {dimension_numbers = #tpu.dot_dimension_numbers<[2], [1], [1], [2], [0, 0, 0, 1, 1, 2], [0], [0]>} : vector<2x8x8xbf16>, vector<2x8x128xbf16>, vector<2x8x128xf32> -> vector<2x8x128xf32>
    "tpu.trace_stop"() : () -> ()
    %c0_20 = arith.constant 0 : index
    %c0_21 = arith.constant 0 : index
    %c128 = arith.constant 128 : index
    %56 = vector.load %arg16[%c0_20, %c0_21, %c128] : memref<2x8x256xf32, #tpu.memory_space<vmem>>, vector<2x8x128xf32>
    tpu.vector_store %arg16[%c0_20, %c0_21, %c128], %55 {strides = array<i32>} : memref<2x8x256xf32, #tpu.memory_space<vmem>>, vector<2x8x128xf32>,
    %c0_22 = arith.constant 0 : index
    %c0_23 = arith.constant 0 : index
    %c0_24 = arith.constant 0 : index
    %57 = vector.load %arg16[%c0_22, %c0_23, %c0_24] : memref<2x8x256xf32, #tpu.memory_space<vmem>>, vector<2x8x256xf32>
    %58 = vector.shape_cast %57 : vector<2x8x256xf32> to vector<16x256xf32>
    %59 = arith.truncf %58 : vector<16x256xf32> to vector<16x256xbf16>
    %c0_25 = arith.constant 0 : index
    %c0_26 = arith.constant 0 : index
    %60 = vector.load %arg5[%c0_25, %c0_26] : memref<256x256xbf16, #tpu.memory_space<vmem>>, vector<256x256xbf16>
    %cst_27 = arith.constant dense<0.000000e+00> : vector<16x256xf32>
    %61 = tpu.matmul %59, %60, %cst_27 {dimension_numbers = #tpu.dot_dimension_numbers<[1], [0], [0], [1], [0, 0, 1, 1], [], []>} : vector<16x256xbf16>, vector<256x256xbf16>, vector<16x256xf32> -> vector<16x256xf32>
    %c0_28 = arith.constant 0 : index
    %c0_29 = arith.constant 0 : index
    %62 = vector.load %arg6[%c0_28, %c0_29] : memref<1x256xf32, #tpu.memory_space<vmem>>, vector<1x256xf32>
    %63 = vector.broadcast %62 : vector<1x256xf32> to vector<16x256xf32>
    %64 = arith.addf %61, %63 : vector<16x256xf32>
    %65 = arith.addf %1, %64 : vector<16x256xf32>
    %cst_30 = arith.constant dense<0.000000e+00> : vector<16xf32>
    %66 = vector.multi_reduction <add>, %65, %cst_30 [1] : vector<16x256xf32> to vector<16xf32>
    %67 = vector.shape_cast %66 : vector<16xf32> to vector<16x1xf32>
    %cst_31 = arith.constant 2.560000e+02 : f32
    %68 = vector.broadcast %cst_31 : f32 to vector<16x1xf32>
    %69 = arith.divf %67, %68 : vector<16x1xf32>
    %70 = vector.broadcast %69 : vector<16x1xf32> to vector<16x256xf32>
    %71 = arith.subf %65, %70 : vector<16x256xf32>
    %72 = arith.mulf %71, %71 : vector<16x256xf32>
    %cst_32 = arith.constant dense<0.000000e+00> : vector<16xf32>
    %73 = vector.multi_reduction <add>, %72, %cst_32 [1] : vector<16x256xf32> to vector<16xf32>
    %74 = vector.shape_cast %73 : vector<16xf32> to vector<16x1xf32>
    %cst_33 = arith.constant 2.560000e+02 : f32
    %75 = vector.broadcast %cst_33 : f32 to vector<16x1xf32>
    %76 = arith.divf %74, %75 : vector<16x1xf32>
    %77 = vector.broadcast %69 : vector<16x1xf32> to vector<16x256xf32>
    %78 = arith.subf %65, %77 : vector<16x256xf32>
    %cst_34 = arith.constant 9.99999974E-6 : f32
    %79 = vector.broadcast %cst_34 : f32 to vector<16x1xf32>
    %80 = arith.addf %76, %79 : vector<16x1xf32>
    %81 = math.rsqrt %80 : vector<16x1xf32>
    %82 = vector.broadcast %81 : vector<16x1xf32> to vector<16x256xf32>
    %83 = arith.mulf %78, %82 : vector<16x256xf32>
    %c0_35 = arith.constant 0 : index
    %c0_36 = arith.constant 0 : index
    %84 = vector.load %arg7[%c0_35, %c0_36] : memref<1x256xf32, #tpu.memory_space<vmem>>, vector<1x256xf32>
    %85 = vector.broadcast %84 : vector<1x256xf32> to vector<16x256xf32>
    %86 = arith.mulf %83, %85 : vector<16x256xf32>
    %c0_37 = arith.constant 0 : index
    %c0_38 = arith.constant 0 : index
    %87 = vector.load %arg8[%c0_37, %c0_38] : memref<1x256xf32, #tpu.memory_space<vmem>>, vector<1x256xf32>
    %88 = vector.broadcast %87 : vector<1x256xf32> to vector<16x256xf32>
    %89 = arith.addf %86, %88 : vector<16x256xf32>
    %90 = arith.truncf %89 : vector<16x256xf32> to vector<16x256xbf16>
    %c0_39 = arith.constant 0 : index
    %c0_40 = arith.constant 0 : index
    %91 = vector.load %arg9[%c0_39, %c0_40] : memref<256x512xbf16, #tpu.memory_space<vmem>>, vector<256x512xbf16>
    %cst_41 = arith.constant dense<0.000000e+00> : vector<16x512xf32>
    %92 = tpu.matmul %90, %91, %cst_41 {dimension_numbers = #tpu.dot_dimension_numbers<[1], [0], [0], [1], [0, 0, 1, 1], [], []>} : vector<16x256xbf16>, vector<256x512xbf16>, vector<16x512xf32> -> vector<16x512xf32>
    %c0_42 = arith.constant 0 : index
    %c0_43 = arith.constant 0 : index
    %93 = vector.load %arg10[%c0_42, %c0_43] : memref<1x512xf32, #tpu.memory_space<vmem>>, vector<1x512xf32>
    %94 = vector.broadcast %93 : vector<1x512xf32> to vector<16x512xf32>
    %95 = arith.addf %92, %94 : vector<16x512xf32>
    %cst_44 = arith.constant 0.000000e+00 : f32
    %96 = vector.broadcast %cst_44 : f32 to vector<16x512xf32>
    %97 = arith.maximumf %95, %96 : vector<16x512xf32>
    %98 = arith.truncf %97 : vector<16x512xf32> to vector<16x512xbf16>
    %c0_45 = arith.constant 0 : index
    %c0_46 = arith.constant 0 : index
    %99 = vector.load %arg11[%c0_45, %c0_46] : memref<512x256xbf16, #tpu.memory_space<vmem>>, vector<512x256xbf16>
    %cst_47 = arith.constant dense<0.000000e+00> : vector<16x256xf32>
    %100 = tpu.matmul %98, %99, %cst_47 {dimension_numbers = #tpu.dot_dimension_numbers<[1], [0], [0], [1], [0, 0, 1, 1], [], []>} : vector<16x512xbf16>, vector<512x256xbf16>, vector<16x256xf32> -> vector<16x256xf32>
    %c0_48 = arith.constant 0 : index
    %c0_49 = arith.constant 0 : index
    %101 = vector.load %arg12[%c0_48, %c0_49] : memref<1x256xf32, #tpu.memory_space<vmem>>, vector<1x256xf32>
    %102 = vector.broadcast %101 : vector<1x256xf32> to vector<16x256xf32>
    %103 = arith.addf %100, %102 : vector<16x256xf32>
    %104 = arith.addf %89, %103 : vector<16x256xf32>
    %cst_50 = arith.constant dense<0.000000e+00> : vector<16xf32>
    %105 = vector.multi_reduction <add>, %104, %cst_50 [1] : vector<16x256xf32> to vector<16xf32>
    %106 = vector.shape_cast %105 : vector<16xf32> to vector<16x1xf32>
    %cst_51 = arith.constant 2.560000e+02 : f32
    %107 = vector.broadcast %cst_51 : f32 to vector<16x1xf32>
    %108 = arith.divf %106, %107 : vector<16x1xf32>
    %109 = vector.broadcast %108 : vector<16x1xf32> to vector<16x256xf32>
    %110 = arith.subf %104, %109 : vector<16x256xf32>
    %111 = arith.mulf %110, %110 : vector<16x256xf32>
    %cst_52 = arith.constant dense<0.000000e+00> : vector<16xf32>
    %112 = vector.multi_reduction <add>, %111, %cst_52 [1] : vector<16x256xf32> to vector<16xf32>
    %113 = vector.shape_cast %112 : vector<16xf32> to vector<16x1xf32>
    %cst_53 = arith.constant 2.560000e+02 : f32
    %114 = vector.broadcast %cst_53 : f32 to vector<16x1xf32>
    %115 = arith.divf %113, %114 : vector<16x1xf32>
    %116 = vector.broadcast %108 : vector<16x1xf32> to vector<16x256xf32>
    %117 = arith.subf %104, %116 : vector<16x256xf32>
    %cst_54 = arith.constant 9.99999974E-6 : f32
    %118 = vector.broadcast %cst_54 : f32 to vector<16x1xf32>
    %119 = arith.addf %115, %118 : vector<16x1xf32>
    %120 = math.rsqrt %119 : vector<16x1xf32>
    %121 = vector.broadcast %120 : vector<16x1xf32> to vector<16x256xf32>
    %122 = arith.mulf %117, %121 : vector<16x256xf32>
    %c0_55 = arith.constant 0 : index
    %c0_56 = arith.constant 0 : index
    %123 = vector.load %arg13[%c0_55, %c0_56] : memref<1x256xf32, #tpu.memory_space<vmem>>, vector<1x256xf32>
    %124 = vector.broadcast %123 : vector<1x256xf32> to vector<16x256xf32>
    %125 = arith.mulf %122, %124 : vector<16x256xf32>
    %c0_57 = arith.constant 0 : index
    %c0_58 = arith.constant 0 : index
    %126 = vector.load %arg14[%c0_57, %c0_58] : memref<1x256xf32, #tpu.memory_space<vmem>>, vector<1x256xf32>
    %127 = vector.broadcast %126 : vector<1x256xf32> to vector<16x256xf32>
    %128 = arith.addf %125, %127 : vector<16x256xf32>
    %129 = vector.shape_cast %128 : vector<16x256xf32> to vector<2x8x256xf32>
    %c0_59 = arith.constant 0 : index
    %c0_60 = arith.constant 0 : index
    %c0_61 = arith.constant 0 : index
    %130 = vector.load %arg15[%c0_59, %c0_60, %c0_61] : memref<2x8x256xf32, #tpu.memory_space<vmem>>, vector<2x8x256xf32>
    tpu.vector_store %arg15[%c0_59, %c0_60, %c0_61], %129 {strides = array<i32>} : memref<2x8x256xf32, #tpu.memory_space<vmem>>, vector<2x8x256xf32>,
    return
  }
  func.func @transform_0(%arg0: i32) -> (i32, i32, i32) {
    %c0_i32 = arith.constant 0 : i32
    %c0_i32_0 = arith.constant 0 : i32
    %c0_i32_1 = arith.constant 0 : i32
    return %arg0, %c0_i32, %c0_i32_0 : i32, i32, i32
  }
  func.func @transform_1(%arg0: i32) -> (i32, i32) {
    %c0_i32 = arith.constant 0 : i32
    %c0_i32_0 = arith.constant 0 : i32
    %c0_i32_1 = arith.constant 0 : i32
    return %c0_i32, %c0_i32_0 : i32, i32
  }
  func.func @transform_2(%arg0: i32) -> (i32, i32) {
    %c0_i32 = arith.constant 0 : i32
    %c0_i32_0 = arith.constant 0 : i32
    %c0_i32_1 = arith.constant 0 : i32
    return %c0_i32, %c0_i32_0 : i32, i32
  }
  func.func @transform_3(%arg0: i32) -> (i32, i32) {
    %c0_i32 = arith.constant 0 : i32
    %c0_i32_0 = arith.constant 0 : i32
    %c0_i32_1 = arith.constant 0 : i32
    return %c0_i32, %c0_i32_0 : i32, i32
  }
  func.func @transform_4(%arg0: i32) -> (i32, i32) {
    %c0_i32 = arith.constant 0 : i32
    %c0_i32_0 = arith.constant 0 : i32
    %c0_i32_1 = arith.constant 0 : i32
    return %c0_i32, %c0_i32_0 : i32, i32
  }
  func.func @transform_5(%arg0: i32) -> (i32, i32) {
    %c0_i32 = arith.constant 0 : i32
    %c0_i32_0 = arith.constant 0 : i32
    %c0_i32_1 = arith.constant 0 : i32
    return %c0_i32, %c0_i32_0 : i32, i32
  }
  func.func @transform_6(%arg0: i32) -> (i32, i32) {
    %c0_i32 = arith.constant 0 : i32
    %c0_i32_0 = arith.constant 0 : i32
    %c0_i32_1 = arith.constant 0 : i32
    return %c0_i32, %c0_i32_0 : i32, i32
  }
  func.func @transform_7(%arg0: i32) -> (i32, i32) {
    %c0_i32 = arith.constant 0 : i32
    %c0_i32_0 = arith.constant 0 : i32
    %c0_i32_1 = arith.constant 0 : i32
    return %c0_i32, %c0_i32_0 : i32, i32
  }
  func.func @transform_8(%arg0: i32) -> (i32, i32) {
    %c0_i32 = arith.constant 0 : i32
    %c0_i32_0 = arith.constant 0 : i32
    %c0_i32_1 = arith.constant 0 : i32
    return %c0_i32, %c0_i32_0 : i32, i32
  }
  func.func @transform_9(%arg0: i32) -> (i32, i32) {
    %c0_i32 = arith.constant 0 : i32
    %c0_i32_0 = arith.constant 0 : i32
    %c0_i32_1 = arith.constant 0 : i32
    return %c0_i32, %c0_i32_0 : i32, i32
  }
  func.func @transform_10(%arg0: i32) -> (i32, i32) {
    %c0_i32 = arith.constant 0 : i32
    %c0_i32_0 = arith.constant 0 : i32
    %c0_i32_1 = arith.constant 0 : i32
    return %c0_i32, %c0_i32_0 : i32, i32
  }
  func.func @transform_11(%arg0: i32) -> (i32, i32) {
    %c0_i32 = arith.constant 0 : i32
    %c0_i32_0 = arith.constant 0 : i32
    %c0_i32_1 = arith.constant 0 : i32
    return %c0_i32, %c0_i32_0 : i32, i32
  }
  func.func @transform_12(%arg0: i32) -> (i32, i32) {
    %c0_i32 = arith.constant 0 : i32
    %c0_i32_0 = arith.constant 0 : i32
    %c0_i32_1 = arith.constant 0 : i32
    return %c0_i32, %c0_i32_0 : i32, i32
  }
  func.func @transform_13(%arg0: i32) -> (i32, i32) {
    %c0_i32 = arith.constant 0 : i32
    %c0_i32_0 = arith.constant 0 : i32
    %c0_i32_1 = arith.constant 0 : i32
    return %c0_i32, %c0_i32_0 : i32, i32
  }
  func.func @transform_14(%arg0: i32) -> (i32, i32, i32) {
    %c0_i32 = arith.constant 0 : i32
    %c0_i32_0 = arith.constant 0 : i32
    %c0_i32_1 = arith.constant 0 : i32
    return %arg0, %c0_i32, %c0_i32_0 : i32, i32, i32
  }
}

</mosaic_0001>

<bundles_post_ra>
// kernel: tpu_custom_call.1
= control target key start
LH: loop header
LB: loop body
LE: loop exit
PB: predicated region body
PF: predicated region fallthrough
CT: control target
= control target key end

     0   :  { %19 = vsyncpa [#allocation4], 0  ;;  %s4464_s0 = inlined_call_operand.hbm [shape: f32[2,8,256], index: 0, kind: input, shape index: {}]   ;;  %s4465_s1 = inlined_call_operand.hbm [shape: f32[8,512], index: 1, kind: input, shape index: {}]   ;;  %s4466_s2 = inlined_call_operand.hbm [shape: bf16[256,768], index: 2, kind: input, shape index: {}]   ;;  %s4467_s3 = inlined_call_operand.hbm [shape: f32[1,768], index: 3, kind: input, shape index: {}]   ;;  %s4468_s4 = inlined_call_operand.hbm [shape: bf16[256,256], index: 4, kind: input, shape index: {}]   ;;  %s4469_s5 = inlined_call_operand.vmem [shape: f32[1,256], index: 5, kind: input, shape index: {}]   ;;  %s4470_s6 = inlined_call_operand.hbm [shape: f32[1,256], index: 6, kind: input, shape index: {}]   ;;  %s4471_s7 = inlined_call_operand.hbm [shape: f32[1,256], index: 7, kind: input, shape index: {}]   ;;  %s4472_s8 = inlined_call_operand.hbm [shape: bf16[256,512], index: 8, kind: input, shape index: {}]   ;;  %s4473_s9 = inlined_call_operand.vmem [shape: f32[1,512], index: 9, kind: input, shape index: {}]   ;;  %s4474_s10 = inlined_call_operand.hbm [shape: bf16[512,256], index: 10, kind: input, shape index: {}]   ;;  %s4475_s11 = inlined_call_operand.vmem [shape: f32[1,256], index: 11, kind: input, shape index: {}]   ;;  %s4476_s12 = inlined_call_operand.vmem [shape: f32[1,256], index: 12, kind: input, shape index: {}]   ;;  %s4477_s13 = inlined_call_operand.vmem [shape: f32[1,256], index: 13, kind: input, shape index: {}]   ;;  %s4478_s14 = inlined_call_operand.hbm [shape: f32[2,8,256], index: 14, kind: output, shape index: {}]  }
   0x1   :  { %20 = vsyncpa [#allocation7], 0 }
   0x2   :  { %21 = vsyncpa [#allocation10], 0 }
   0x3   :  { %22 = vsyncpa [#allocation13], 0 }
   0x4   :  { %23 = vsyncpa [#allocation16], 0  ;;  %s43_s15 = sshll.u32 %s4465_s1, 4  ;;  %s44_s15 = int_to_ptr.hbm [resolvable:$true] %s43_s15 }
   0x5   :  { %24 = vsyncpa [#allocation5], 0  ;;  %s4212_s16 = smov [#allocation6]   ;;  %s67_s20 = sshll.u32 %s4467_s3, 4  ;;  %s68_s20 = int_to_ptr.hbm [resolvable:$true] %s67_s20 }
   0x6   :  { %s45_s17 = sshll.u32 %s4212_s16, 4  ;;  %s4213_s21 = smov [#allocation9]   ;;  %s46_s17 = int_to_ptr.vmem [resolvable:$true] %s45_s17 }
   0x7   :  { %48 = dma.hbm_to_vmem [thread:$0]  %s44_s15, 512, %s46_s17, [#allocation7]  }
   0x8   :  { %s69_s22 = sshll.u32 %s4213_s21, 4  ;;  %s93_s25 = sshll.u32 %s4470_s6, 4  ;;  %s70_s22 = int_to_ptr.vmem [resolvable:$true] %s69_s22  ;;  %s94_s25 = int_to_ptr.hbm [resolvable:$true] %s93_s25 }
   0x9   :  { %72 = dma.hbm_to_vmem [thread:$0]  %s68_s20, 96, %s70_s22, [#allocation10]  }
   0xa   :  { %s4214_s1 = smov [#allocation12]   ;;  %s114_s29 = sshll.u32 %s4472_s8, 4  ;;  %s115_s29 = int_to_ptr.hbm [resolvable:$true] %s114_s29 }
   0xb   :  { %s95_s26 = sshll.u32 %s4214_s1, 4  ;;  %s4215_s3 = smov [#allocation15]   ;;  %s96_s26 = int_to_ptr.vmem [resolvable:$true] %s95_s26 }
   0xc   :  { %98 = dma.hbm_to_vmem [thread:$0]  %s94_s25, 32, %s96_s26, [#allocation13]  }
   0xd   :  { %s116_s30 = sshll.u32 %s4215_s3, 4  ;;  %s29_s17 = sshll.u32 %s4464_s0, 4  ;;  %s117_s30 = int_to_ptr.vmem [resolvable:$true] %s116_s30  ;;  %s30_s17 = int_to_ptr.hbm [resolvable:$true] %s29_s17 }
   0xe   :  { %s4216_s6 = smov 256   ;;  %s4217_s18 = smov 16  }
   0xf   :  { %122 = dma.hbm_to_vmem [thread:$0]  %s115_s29, 8192, %s117_s30, [#allocation16], %s4216_s6, %s4216_s6, %s4217_s18  }
  0x10   :  { %s53_s8 = sshll.u32 %s4466_s2, 4  ;;  %s4218_s21 = smov [#allocation3]   ;;  %s54_s8 = int_to_ptr.hbm [resolvable:$true] %s53_s8 }
  0x11   :  { %s31_s22 = sshll.u32 %s4218_s21, 4  ;;  %s4219_s0 = smov [#allocation8]   ;;  %s32_s22 = int_to_ptr.vmem [resolvable:$true] %s31_s22 }
  0x12   :  { %37 = dma.hbm_to_vmem [thread:$0]  %s30_s17, 512, %s32_s22, [#allocation4], %s4216_s6, %s4216_s6, %s4217_s18  }
  0x13   :  { %s55_s23 = sshll.u32 %s4219_s0, 4  ;;  %s4220_s24 = smov 384   ;;  %s56_s23 = int_to_ptr.vmem [resolvable:$true] %s55_s23 }
  0x14   :  { %s4221_s25 = smov 24   ;;  %s77_s27 = sshll.u32 %s4468_s4, 4  ;;  %s78_s27 = int_to_ptr.hbm [resolvable:$true] %s77_s27 }
  0x15   :  { %61 = dma.hbm_to_vmem [thread:$0]  %s54_s8, 12288, %s56_s23, [#allocation7], %s4220_s24, %s4220_s24, %s4221_s25  }
  0x16   :  { %s4222_s2 = smov [#allocation11]   ;;  %s104_s30 = sshll.u32 %s4471_s7, 4  ;;  %s105_s30 = int_to_ptr.hbm [resolvable:$true] %s104_s30 }
  0x17   :  { %s79_s28 = sshll.u32 %s4222_s2, 4  ;;  %s4223_s15 = smov 128   ;;  %s80_s28 = int_to_ptr.vmem [resolvable:$true] %s79_s28 }
  0x18   :  { %s4224_s16 = smov 8   ;;  %s4225_s17 = smov [#allocation14]  }
  0x19   :  { %85 = dma.hbm_to_vmem [thread:$0]  %s78_s27, 4096, %s80_s28, [#allocation10], %s4223_s15, %s4223_s15, %s4224_s16  }
  0x1a   :  { %s106_s19 = sshll.u32 %s4225_s17, 4  ;;  %s129_s21 = sshll.u32 %s4474_s10, 4  ;;  %s107_s19 = int_to_ptr.vmem [resolvable:$true] %s106_s19  ;;  %s130_s21 = int_to_ptr.hbm [resolvable:$true] %s129_s21 }
  0x1b   :  { %109 = dma.hbm_to_vmem [thread:$0]  %s105_s30, 32, %s107_s19, [#allocation13]  }
  0x1c   :  { %s4226_s4 = smov [#allocation17]  }
  0x1d   :  { %s131_s22 = sshll.u32 %s4226_s4, 4  ;;  %s132_s22 = int_to_ptr.vmem [resolvable:$true] %s131_s22 }
  0x1e   :  { %137 = dma.hbm_to_vmem [thread:$0]  %s130_s21, 8192, %s132_s22, [#allocation16], %s4223_s15, %s4223_s15, %s4224_s16  }
  0x1f   :  { %4200 = dma.done.wait [#allocation4], 512  }
  0x20   :  { %4201 = vsyncadd [#allocation4], 4294966784 }
  0x21   :  { %4202 = dma.done.wait [#allocation7], 12800  }
  0x22   :  { %4203 = vsyncadd [#allocation7], 4294954496 }
  0x23   :  { %4204 = dma.done.wait [#allocation10], 4192  }
  0x24   :  { %4205 = vsyncadd [#allocation10], 4294963104 }
  0x25   :  { %4206 = dma.done.wait [#allocation13], 64  }
  0x26   :  { %4207 = vsyncadd [#allocation13], 4294967232 }
  0x27   :  { %4208 = dma.done.wait [#allocation16], 16384  }
  0x28   :  { %4209 = vsyncadd [#allocation16], 4294950912  ;;  %v2799_v0 = vld [vmem:[#allocation8 + $0x150] sm:$0xf]  ;;  %v3702_v1 = vld [vmem:[#allocation8 + $0x164] sm:$0xf0] }
  0x29   :  { %v2991_v2 = vld [vmem:[#allocation8 + $0x2d0] sm:$0xf]  ;;  %v2800_v3 = vor.u32 %v3702_v1, %v2799_v0  ;;  %v3750_v4 = vld [vmem:[#allocation8 + $0x2e4] sm:$0xf0]  ;;  %v3699_v5 = vld [vmem:[#allocation8 + $0x154] sm:$0xf] }
  0x2a   :  { %v2801_v6 = vld [vmem:[#allocation8 + $0x168] sm:$0xf0]  ;;  %v2992_v7 = vor.u32 %v3750_v4, %v2991_v2  ;;  %v3747_v9 = vld [vmem:[#allocation8 + $0x2d4] sm:$0xf]  ;;  %v2775_v11 = vld [vmem:[#allocation8 + $0x120] sm:$0xf] }
  0x2b   :  { %v2804_v8 = vor.u32 %v3699_v5, %v2801_v6  ;;  %v2993_v10 = vld [vmem:[#allocation8 + $0x2e8] sm:$0xf0]  ;;  %777 = vmatpush.bf16.msra.mxu0 %v2800_v3  ;;  %v3696_v13 = vld [vmem:[#allocation8 + $0x134] sm:$0xf0]  ;;  %v2967_v14 = vld [vmem:[#allocation8 + $0x2a0] sm:$0xf] }
  0x2c   :  { %v2996_v12 = vor.u32 %v3747_v9, %v2993_v10  ;;  %v3744_v15 = vld [vmem:[#allocation8 + $0x2b4] sm:$0xf0]  ;;  %791 = vmatpush.bf16.msra.mxu1 %v2992_v7  ;;  %v2776_v16 = vor.u32 %v3696_v13, %v2775_v11  ;;  %v3693_v18 = vld [vmem:[#allocation8 + $0x124] sm:$0xf]  ;;  %v2777_v19 = vld [vmem:[#allocation8 + $0x138] sm:$0xf0] }
  0x2d   :  { %805 = vmatpush.bf16.msra.mxu2 %v2804_v8  ;;  %v2968_v17 = vor.u32 %v3744_v15, %v2967_v14  ;;  %v3741_v20 = vld [vmem:[#allocation8 + $0x2a4] sm:$0xf]  ;;  %v2780_v21 = vor.u32 %v3693_v18, %v2777_v19  ;;  %v2969_v22 = vld [vmem:[#allocation8 + $0x2b8] sm:$0xf0]  ;;  %v2751_v23 = vld [vmem:[#allocation8 + $0xf0] sm:$0xf] }
  0x2e   :  { %819 = vmatpush.bf16.msra.mxu3 %v2996_v12  ;;  %v3690_v24 = vld [vmem:[#allocation8 + $0x104] sm:$0xf0]  ;;  %v2972_v25 = vor.u32 %v3741_v20, %v2969_v22  ;;  %v2943_v26 = vld [vmem:[#allocation8 + $0x270] sm:$0xf]  ;;  %v3687_v28 = vld [vmem:[#allocation8 + $0xf4] sm:$0xf] }
  0x2f   :  { %v3738_v27 = vld [vmem:[#allocation8 + $0x284] sm:$0xf0]  ;;  %778 = vmatpush.bf16.msra.mxu0 %v2776_v16  ;;  %v2752_v29 = vor.u32 %v3690_v24, %v2751_v23  ;;  %v2753_v30 = vld [vmem:[#allocation8 + $0x108] sm:$0xf0]  ;;  %v3735_v31 = vld [vmem:[#allocation8 + $0x274] sm:$0xf] }
  0x30   :  { %v2945_v32 = vld [vmem:[#allocation8 + $0x288] sm:$0xf0]  ;;  %792 = vmatpush.bf16.msra.mxu1 %v2968_v17  ;;  %v2944_v33 = vor.u32 %v3738_v27, %v2943_v26  ;;  %v2756_v34 = vor.u32 %v3687_v28, %v2753_v30  ;;  %v2727_v35 = vld [vmem:[#allocation8 + $0xc0] sm:$0xf]  ;;  %v3684_v36 = vld [vmem:[#allocation8 + $0xd4] sm:$0xf0] }
  0x31   :  { %806 = vmatpush.bf16.msra.mxu2 %v2780_v21  ;;  %v2919_v37 = vld [vmem:[#allocation8 + $0x240] sm:$0xf]  ;;  %v2948_v38 = vor.u32 %v3735_v31, %v2945_v32  ;;  %v3732_v39 = vld [vmem:[#allocation8 + $0x254] sm:$0xf0]  ;;  %v3681_v40 = vld [vmem:[#allocation8 + $0xc4] sm:$0xf]  ;;  %v2728_v44 = vor.u32 %v3684_v36, %v2727_v35 }
  0x32   :  { %820 = vmatpush.bf16.msra.mxu3 %v2972_v25  ;;  %v2729_v41 = vld [vmem:[#allocation8 + $0xd8] sm:$0xf0]  ;;  %v3729_v42 = vld [vmem:[#allocation8 + $0x244] sm:$0xf]  ;;  %v2920_v45 = vor.u32 %v3732_v39, %v2919_v37  ;;  %v2703_v47 = vld [vmem:[#allocation8 + $0x90] sm:$0xf] }
  0x33   :  { %v2921_v43 = vld [vmem:[#allocation8 + $0x258] sm:$0xf0]  ;;  %779 = vmatpush.bf16.msra.mxu0 %v2752_v29  ;;  %v2732_v46 = vor.u32 %v3681_v40, %v2729_v41  ;;  %v3678_v48 = vld [vmem:[#allocation8 + $0xa4] sm:$0xf0]  ;;  %v2895_v49 = vld [vmem:[#allocation8 + $0x210] sm:$0xf] }
  0x34   :  { %793 = vmatpush.bf16.msra.mxu1 %v2944_v33  ;;  %v2924_v50 = vor.u32 %v3729_v42, %v2921_v43  ;;  %v3726_v51 = vld [vmem:[#allocation8 + $0x224] sm:$0xf0]  ;;  %v3675_v52 = vld [vmem:[#allocation8 + $0x94] sm:$0xf]  ;;  %v2705_v53 = vld [vmem:[#allocation8 + $0xa8] sm:$0xf0]  ;;  %v2704_v56 = vor.u32 %v3678_v48, %v2703_v47 }
  0x35   :  { %807 = vmatpush.bf16.msra.mxu2 %v2756_v34  ;;  %v3723_v54 = vld [vmem:[#allocation8 + $0x214] sm:$0xf]  ;;  %v2897_v55 = vld [vmem:[#allocation8 + $0x228] sm:$0xf0]  ;;  %v2896_v57 = vor.u32 %v3726_v51, %v2895_v49  ;;  %v2708_v58 = vor.u32 %v3675_v52, %v2705_v53  ;;  %v2679_v59 = vld [vmem:[#allocation8 + $0x60] sm:$0xf] }
  0x36   :  { %821 = vmatpush.bf16.msra.mxu3 %v2948_v38  ;;  %v3672_v60 = vld [vmem:[#allocation8 + $0x74] sm:$0xf0]  ;;  %v2871_v61 = vld [vmem:[#allocation8 + $0x1e0] sm:$0xf]  ;;  %v2900_v62 = vor.u32 %v3723_v54, %v2897_v55  ;;  %v3669_v0 = vld [vmem:[#allocation8 + $0x64] sm:$0xf] }
  0x37   :  { %780 = vmatpush.bf16.msra.mxu0 %v2728_v44  ;;  %v3720_v63 = vld [vmem:[#allocation8 + $0x1f4] sm:$0xf0]  ;;  %v2681_v1 = vld [vmem:[#allocation8 + $0x78] sm:$0xf0]  ;;  %v3717_v2 = vld [vmem:[#allocation8 + $0x1e4] sm:$0xf]  ;;  %v2680_v4 = vor.u32 %v3672_v60, %v2679_v59 }
  0x38   :  { %794 = vmatpush.bf16.msra.mxu1 %v2920_v45  ;;  %v2873_v3 = vld [vmem:[#allocation8 + $0x1f8] sm:$0xf0]  ;;  %v2872_v5 = vor.u32 %v3720_v63, %v2871_v61  ;;  %v2684_v6 = vor.u32 %v3669_v0, %v2681_v1  ;;  %v2655_v7 = vld [vmem:[#allocation8 + $0x30] sm:$0xf]  ;;  %v3666_v8 = vld [vmem:[#allocation8 + $0x44] sm:$0xf0] }
  0x39   :  { %808 = vmatpush.bf16.msra.mxu2 %v2732_v46  ;;  %v2847_v9 = vld [vmem:[#allocation8 + $0x1b0] sm:$0xf]  ;;  %v2876_v10 = vor.u32 %v3717_v2, %v2873_v3  ;;  %v3714_v11 = vld [vmem:[#allocation8 + $0x1c4] sm:$0xf0]  ;;  %v3663_v12 = vld [vmem:[#allocation8 + $0x34] sm:$0xf]  ;;  %v2656_v16 = vor.u32 %v3666_v8, %v2655_v7 }
  0x3a   :  { %822 = vmatpush.bf16.msra.mxu3 %v2924_v50  ;;  %v2657_v13 = vld [vmem:[#allocation8 + $0x48] sm:$0xf0]  ;;  %v3711_v14 = vld [vmem:[#allocation8 + $0x1b4] sm:$0xf]  ;;  %v2631_v17 = vld [vmem:[#allocation8] sm:$0xf]  ;;  %v2848_v20 = vor.u32 %v3714_v11, %v2847_v9 }
  0x3b   :  { %781 = vmatpush.bf16.msra.mxu0 %v2704_v56  ;;  %v2849_v15 = vld [vmem:[#allocation8 + $0x1c8] sm:$0xf0]  ;;  %v3660_v18 = vld [vmem:[#allocation8 + $0x14] sm:$0xf0]  ;;  %v2823_v19 = vld [vmem:[#allocation8 + $0x180] sm:$0xf]  ;;  %v2660_v21 = vor.u32 %v3663_v12, %v2657_v13 }
  0x3c   :  { %795 = vmatpush.bf16.msra.mxu1 %v2896_v57  ;;  %v3708_v22 = vld [vmem:[#allocation8 + $0x194] sm:$0xf0]  ;;  %v3657_v23 = vld [vmem:[#allocation8 + $0x4] sm:$0xf]  ;;  %v2633_v24 = vld [vmem:[#allocation8 + $0x18] sm:$0xf0]  ;;  %v2852_v25 = vor.u32 %v3711_v14, %v2849_v15  ;;  %v2632_v32 = vor.u32 %v3660_v18, %v2631_v17 }
  0x3d   :  { %809 = vmatpush.bf16.msra.mxu2 %v2708_v58  ;;  %v3705_v26 = vld [vmem:[#allocation8 + $0x184] sm:$0xf]  ;;  %v2825_v27 = vld [vmem:[#allocation8 + $0x198] sm:$0xf0]  ;;  %v2807_v28 = vld [vmem:[#allocation8 + $0x158] sm:$0xf]  ;;  %v2824_v36 = vor.u32 %v3708_v22, %v2823_v19  ;;  %v2636_v37 = vor.u32 %v3657_v23, %v2633_v24 }
  0x3e   :  { %823 = vmatpush.bf16.msra.mxu3 %v2900_v62  ;;  %v3703_v29 = vld [vmem:[#allocation8 + $0x16c] sm:$0xf0]  ;;  %v2999_v30 = vld [vmem:[#allocation8 + $0x2d8] sm:$0xf]  ;;  %v3700_v33 = vld [vmem:[#allocation8 + $0x15c] sm:$0xf]  ;;  %v2828_v41 = vor.u32 %v3705_v26, %v2825_v27 }
  0x3f   :  { %782 = vmatpush.bf16.msra.mxu0 %v2680_v4  ;;  %v3751_v31 = vld [vmem:[#allocation8 + $0x2ec] sm:$0xf0]  ;;  %v2809_v34 = vld [vmem:[#allocation8 + $0x170] sm:$0xf0]  ;;  %v3748_v35 = vld [vmem:[#allocation8 + $0x2dc] sm:$0xf]  ;;  %v2808_v42 = vor.u32 %v3703_v29, %v2807_v28 }
  0x40   :  { %796 = vmatpush.bf16.msra.mxu1 %v2872_v5  ;;  %v3001_v38 = vld [vmem:[#allocation8 + $0x2f0] sm:$0xf0]  ;;  %v181_v39 = vld [vmem:[#allocation3] sm:$0xff]  ;;  %v2783_v43 = vld [vmem:[#allocation8 + $0x128] sm:$0xf]  ;;  %v3000_v45 = vor.u32 %v3751_v31, %v2999_v30  ;;  %v2812_v46 = vor.u32 %v3700_v33, %v2809_v34  ;;  %vm1021_vm0 = vcmask 1043456  }
  0x41   :  { %810 = vmatpush.bf16.msra.mxu2 %v2684_v6  ;;  %v183_v40 = vld [vmem:[#allocation3 + $0x10] sm:$0xff]  ;;  %v3697_v44 = vld [vmem:[#allocation8 + $0x13c] sm:$0xf0]  ;;  %v2975_v47 = vld [vmem:[#allocation8 + $0x2a8] sm:$0xf]  ;;  %v3004_v50 = vor.u32 %v3748_v35, %v3001_v38  ;;  %vm993_vm1 = vcmask 64512  }
  0x42   :  { %824 = vmatpush.bf16.msra.mxu3 %v2876_v10  ;;  %v182_v48 = vld [vmem:[#allocation3 + $0x8] sm:$0xff]  ;;  %v184_v49 = vld [vmem:[#allocation3 + $0x18] sm:$0xff]  ;;  %v3745_v51 = vld [vmem:[#allocation8 + $0x2bc] sm:$0xf0]  ;;  %v4337_v54 = vpack.c.bf16 %v183_v40, %v181_v39  ;;  %v2784_v58 = vor.u32 %v3697_v44, %v2783_v43  ;;  %s2612_s2 = sshll.u32 %s4478_s14, 4  ;;  %s2613_s2 = int_to_ptr.hbm [resolvable:$true] %s2612_s2 }
  0x43   :  { %783 = vmatpush.bf16.msra.mxu0 %v2656_v16  ;;  %v3694_v52 = vld [vmem:[#allocation8 + $0x12c] sm:$0xf]  ;;  %v2785_v53 = vld [vmem:[#allocation8 + $0x140] sm:$0xf0]  ;;  %v4339_v57 = vpack.c.bf16 %v184_v49, %v182_v48  ;;  %v2976_v59 = vor.u32 %v3745_v51, %v2975_v47  ;;  %v2759_v61 = vld [vmem:[#allocation8 + $0xf8] sm:$0xf] }
  0x44   :  { %797 = vmatpush.bf16.msra.mxu1 %v2848_v20  ;;  %v3742_v55 = vld [vmem:[#allocation8 + $0x2ac] sm:$0xf]  ;;  %v2977_v56 = vld [vmem:[#allocation8 + $0x2c0] sm:$0xf0]  ;;  %v2788_v60 = vor.u32 %v3694_v52, %v2785_v53  ;;  %v3691_v62 = vld [vmem:[#allocation8 + $0x10c] sm:$0xf0] }
  0x45   :  { %811 = vmatpush.bf16.msra.mxu2 %v2660_v21  ;;  %v2951_v63 = vld [vmem:[#allocation8 + $0x278] sm:$0xf]  ;;  %v2980_v0 = vor.u32 %v3742_v55, %v2977_v56  ;;  %v3739_v1 = vld [vmem:[#allocation8 + $0x28c] sm:$0xf0]  ;;  %v3688_v2 = vld [vmem:[#allocation8 + $0xfc] sm:$0xf]  ;;  %v2760_v6 = vor.u32 %v3691_v62, %v2759_v61 }
  0x46   :  { %825 = vmatpush.bf16.msra.mxu3 %v2852_v25  ;;  %v2761_v3 = vld [vmem:[#allocation8 + $0x110] sm:$0xf0]  ;;  %v3736_v4 = vld [vmem:[#allocation8 + $0x27c] sm:$0xf]  ;;  %v2952_v7 = vor.u32 %v3739_v1, %v2951_v63  ;;  %v2735_v9 = vld [vmem:[#allocation8 + $0xc8] sm:$0xf] }
  0x47   :  { %784 = vmatpush.bf16.msra.mxu0 %v2632_v32  ;;  %v2953_v5 = vld [vmem:[#allocation8 + $0x290] sm:$0xf0]  ;;  %v2764_v8 = vor.u32 %v3688_v2, %v2761_v3  ;;  %v3685_v10 = vld [vmem:[#allocation8 + $0xdc] sm:$0xf0]  ;;  %v2927_v11 = vld [vmem:[#allocation8 + $0x248] sm:$0xf] }
  0x48   :  { %798 = vmatpush.bf16.msra.mxu1 %v2824_v36  ;;  %v2956_v12 = vor.u32 %v3736_v4, %v2953_v5  ;;  %v3733_v13 = vld [vmem:[#allocation8 + $0x25c] sm:$0xf0]  ;;  %v3682_v14 = vld [vmem:[#allocation8 + $0xcc] sm:$0xf]  ;;  %v2737_v15 = vld [vmem:[#allocation8 + $0xe0] sm:$0xf0]  ;;  %v2736_v18 = vor.u32 %v3685_v10, %v2735_v9 }
  0x49   :  { %812 = vmatpush.bf16.msra.mxu2 %v2636_v37  ;;  %v3730_v16 = vld [vmem:[#allocation8 + $0x24c] sm:$0xf]  ;;  %v2929_v17 = vld [vmem:[#allocation8 + $0x260] sm:$0xf0]  ;;  %v2928_v19 = vor.u32 %v3733_v13, %v2927_v11  ;;  %v2740_v20 = vor.u32 %v3682_v14, %v2737_v15  ;;  %v2711_v21 = vld [vmem:[#allocation8 + $0x98] sm:$0xf] }
  0x4a   :  { %826 = vmatpush.bf16.msra.mxu3 %v2828_v41  ;;  %785 = vmatmul.bf16.vlgmr.msra.gmra.mxu0 %v4337_v54  ;;  %v3679_v22 = vld [vmem:[#allocation8 + $0xac] sm:$0xf0]  ;;  %v2903_v23 = vld [vmem:[#allocation8 + $0x218] sm:$0xf]  ;;  %v2932_v24 = vor.u32 %v3730_v16, %v2929_v17  ;;  %v3676_v26 = vld [vmem:[#allocation8 + $0x9c] sm:$0xf] }
  0x4b   :  { %833 = vmatpush.bf16.msrb.mxu0 %v2808_v42  ;;  %799 = vmatmul.bf16.vlgmr.msra.gmra.mxu1 %v4339_v57  ;;  %v3727_v25 = vld [vmem:[#allocation8 + $0x22c] sm:$0xf0]  ;;  %v2713_v27 = vld [vmem:[#allocation8 + $0xb0] sm:$0xf0]  ;;  %v3724_v28 = vld [vmem:[#allocation8 + $0x21c] sm:$0xf]  ;;  %v2712_v30 = vor.u32 %v3679_v22, %v2711_v21 }
  0x4c   :  { %847 = vmatpush.bf16.msrb.mxu1 %v3000_v45  ;;  %813 = vmatmul.bf16.vlgmr.msra.gmra.mxu2 %v4337_v54  ;;  %v2905_v29 = vld [vmem:[#allocation8 + $0x230] sm:$0xf0]  ;;  %v2904_v31 = vor.u32 %v3727_v25, %v2903_v23  ;;  %v2716_v32 = vor.u32 %v3676_v26, %v2713_v27  ;;  %v2687_v33 = vld [vmem:[#allocation8 + $0x68] sm:$0xf]  ;;  %v3673_v34 = vld [vmem:[#allocation8 + $0x7c] sm:$0xf0] }
  0x4d   :  { %861 = vmatpush.bf16.msrb.mxu2 %v2812_v46  ;;  %827 = vmatmul.bf16.vlgmr.msra.gmra.mxu3 %v4339_v57  ;;  %v2879_v35 = vld [vmem:[#allocation8 + $0x1e8] sm:$0xf]  ;;  %v2908_v36 = vor.u32 %v3724_v28, %v2905_v29  ;;  %v3721_v37 = vld [vmem:[#allocation8 + $0x1fc] sm:$0xf0]  ;;  %v3670_v38 = vld [vmem:[#allocation8 + $0x6c] sm:$0xf]  ;;  %v2688_v42 = vor.u32 %v3673_v34, %v2687_v33 }
  0x4e   :  { %875 = vmatpush.bf16.msrb.mxu3 %v3004_v50  ;;  %v2689_v39 = vld [vmem:[#allocation8 + $0x80] sm:$0xf0]  ;;  %v3718_v40 = vld [vmem:[#allocation8 + $0x1ec] sm:$0xf]  ;;  %v2880_v43 = vor.u32 %v3721_v37, %v2879_v35  ;;  %v2663_v45 = vld [vmem:[#allocation8 + $0x38] sm:$0xf] }
  0x4f   :  { %834 = vmatpush.bf16.msrb.mxu0 %v2784_v58  ;;  %v2881_v41 = vld [vmem:[#allocation8 + $0x200] sm:$0xf0]  ;;  %v2692_v44 = vor.u32 %v3670_v38, %v2689_v39  ;;  %v3667_v46 = vld [vmem:[#allocation8 + $0x4c] sm:$0xf0]  ;;  %v2855_v47 = vld [vmem:[#allocation8 + $0x1b8] sm:$0xf] }
  0x50   :  { %848 = vmatpush.bf16.msrb.mxu1 %v2976_v59  ;;  %v2884_v48 = vor.u32 %v3718_v40, %v2881_v41  ;;  %v3715_v49 = vld [vmem:[#allocation8 + $0x1cc] sm:$0xf0]  ;;  %v3664_v50 = vld [vmem:[#allocation8 + $0x3c] sm:$0xf]  ;;  %v2665_v51 = vld [vmem:[#allocation8 + $0x50] sm:$0xf0]  ;;  %v2664_v55 = vor.u32 %v3667_v46, %v2663_v45 }
  0x51   :  { %862 = vmatpush.bf16.msrb.mxu2 %v2788_v60  ;;  %v3712_v52 = vld [vmem:[#allocation8 + $0x1bc] sm:$0xf]  ;;  %v2857_v53 = vld [vmem:[#allocation8 + $0x1d0] sm:$0xf0]  ;;  %v2639_v56 = vld [vmem:[#allocation8 + $0x8] sm:$0xf]  ;;  %v2856_v58 = vor.u32 %v3715_v49, %v2855_v47  ;;  %v2668_v59 = vor.u32 %v3664_v50, %v2665_v51 }
  0x52   :  { %876 = vmatpush.bf16.msrb.mxu3 %v2980_v0  ;;  %v3661_v60 = vld [vmem:[#allocation8 + $0x1c] sm:$0xf0]  ;;  %v2831_v61 = vld [vmem:[#allocation8 + $0x188] sm:$0xf]  ;;  %v2860_v63 = vor.u32 %v3712_v52, %v2857_v53  ;;  %v3658_v0 = vld [vmem:[#allocation8 + $0xc] sm:$0xf] }
  0x53   :  { %835 = vmatpush.bf16.msrb.mxu0 %v2760_v6  ;;  %v3709_v62 = vld [vmem:[#allocation8 + $0x19c] sm:$0xf0]  ;;  %v2641_v1 = vld [vmem:[#allocation8 + $0x20] sm:$0xf0]  ;;  %v3706_v2 = vld [vmem:[#allocation8 + $0x18c] sm:$0xf]  ;;  %v2640_v6 = vor.u32 %v3661_v60, %v2639_v56 }
  0x54   :  { %849 = vmatpush.bf16.msrb.mxu1 %v2952_v7  ;;  %v2833_v3 = vld [vmem:[#allocation8 + $0x1a0] sm:$0xf0]  ;;  %v2817_v5 = vld [vmem:[#allocation8 + $0x178] sm:$0xf0]  ;;  %v2832_v9 = vor.u32 %v3709_v62, %v2831_v61  ;;  %v2644_v10 = vor.u32 %v3658_v0, %v2641_v1  ;;  %v3695_v13 = vld [vmem:[#allocation8 + $0x134] sm:$0xf] }
  0x55   :  { %863 = vmatpush.bf16.msrb.mxu2 %v2764_v8  ;;  %v3701_v4 = vld [vmem:[#allocation8 + $0x164] sm:$0xf]  ;;  %v3009_v8 = vld [vmem:[#allocation8 + $0x2f8] sm:$0xf0]  ;;  %v2836_v11 = vor.u32 %v3706_v2, %v2833_v3  ;;  %v2815_v14 = vld [vmem:[#allocation8 + $0x160] sm:$0xf] }
  0x56   :  { %877 = vmatpush.bf16.msrb.mxu3 %v2956_v12  ;;  %v3749_v7 = vld [vmem:[#allocation8 + $0x2e4] sm:$0xf]  ;;  %v2820_v12 = vor.u32 %v3701_v4, %v2817_v5  ;;  %v3704_v15 = vld [vmem:[#allocation8 + $0x174] sm:$0xf0]  ;;  %v2793_v17 = vld [vmem:[#allocation8 + $0x148] sm:$0xf0] }
  0x57   :  { %836 = vmatpush.bf16.msrb.mxu0 %v2736_v18  ;;  %v3012_v16 = vor.u32 %v3749_v7, %v3009_v8  ;;  %v3007_v18 = vld [vmem:[#allocation8 + $0x2e0] sm:$0xf]  ;;  %v2985_v21 = vld [vmem:[#allocation8 + $0x2c8] sm:$0xf0]  ;;  %v2816_v22 = vor.u32 %v3704_v15, %v2815_v14  ;;  %v2796_v23 = vor.u32 %v3695_v13, %v2793_v17  ;;  %v2791_v25 = vld [vmem:[#allocation8 + $0x130] sm:$0xf] }
  0x58   :  { %850 = vmatpush.bf16.msrb.mxu1 %v2928_v19  ;;  %v3752_v19 = vld [vmem:[#allocation8 + $0x2f4] sm:$0xf0]  ;;  %v3698_v26 = vld [vmem:[#allocation8 + $0x144] sm:$0xf0]  ;;  %v3689_v28 = vld [vmem:[#allocation8 + $0x104] sm:$0xf] }
  0x59   :  { %864 = vmatpush.bf16.msrb.mxu2 %v2740_v20  ;;  %v3743_v20 = vld [vmem:[#allocation8 + $0x2b4] sm:$0xf]  ;;  %v2769_v29 = vld [vmem:[#allocation8 + $0x118] sm:$0xf0]  ;;  %v2983_v35 = vld [vmem:[#allocation8 + $0x2b0] sm:$0xf] }
  0x5a   :  { %878 = vmatpush.bf16.msrb.mxu3 %v2932_v24  ;;  %v3008_v24 = vor.u32 %v3752_v19, %v3007_v18  ;;  %v2988_v27 = vor.u32 %v3743_v20, %v2985_v21  ;;  %v2772_v33 = vor.u32 %v3689_v28, %v2769_v29  ;;  %v3683_v37 = vld [vmem:[#allocation8 + $0xd4] sm:$0xf]  ;;  %v2745_v39 = vld [vmem:[#allocation8 + $0xe8] sm:$0xf0]  ;;  %v2767_v41 = vld [vmem:[#allocation8 + $0x100] sm:$0xf] }
  0x5b   :  { %837 = vmatpush.bf16.msrb.mxu0 %v2712_v30  ;;  %v3737_v30 = vld [vmem:[#allocation8 + $0x284] sm:$0xf]  ;;  %v2748_v40 = vor.u32 %v3683_v37, %v2745_v39  ;;  %v2937_v45 = vld [vmem:[#allocation8 + $0x268] sm:$0xf0]  ;;  %v2959_v47 = vld [vmem:[#allocation8 + $0x280] sm:$0xf] }
  0x5c   :  { %851 = vmatpush.bf16.msrb.mxu1 %v2904_v31  ;;  %v2961_v31 = vld [vmem:[#allocation8 + $0x298] sm:$0xf0]  ;;  %v3677_v49 = vld [vmem:[#allocation8 + $0xa4] sm:$0xf]  ;;  %v2743_v53 = vld [vmem:[#allocation8 + $0xd0] sm:$0xf] }
  0x5d   :  { %865 = vmatpush.bf16.msrb.mxu2 %v2716_v32  ;;  %v2792_v32 = vor.u32 %v3698_v26, %v2791_v25  ;;  %v2964_v34 = vor.u32 %v3737_v30, %v2961_v31  ;;  %v2721_v51 = vld [vmem:[#allocation8 + $0xb8] sm:$0xf0]  ;;  %v2935_v61 = vld [vmem:[#allocation8 + $0x250] sm:$0xf]  ;;  %v3734_v62 = vld [vmem:[#allocation8 + $0x264] sm:$0xf0] }
  0x5e   :  { %879 = vmatpush.bf16.msrb.mxu3 %v2908_v36  ;;  %v3746_v36 = vld [vmem:[#allocation8 + $0x2c4] sm:$0xf0]  ;;  %v2724_v52 = vor.u32 %v3677_v49, %v2721_v51  ;;  %v3671_v0 = vld [vmem:[#allocation8 + $0x74] sm:$0xf]  ;;  %v2697_v1 = vld [vmem:[#allocation8 + $0x88] sm:$0xf0] }
  0x5f   :  { %838 = vmatpush.bf16.msrb.mxu0 %v2688_v42  ;;  %v2984_v38 = vor.u32 %v3746_v36, %v2983_v35  ;;  %v3692_v42 = vld [vmem:[#allocation8 + $0x114] sm:$0xf0]  ;;  %v2700_v2 = vor.u32 %v3671_v0, %v2697_v1  ;;  %v2719_v3 = vld [vmem:[#allocation8 + $0xa0] sm:$0xf]  ;;  %v3719_v5 = vld [vmem:[#allocation8 + $0x1f4] sm:$0xf] }
  0x60   :  { %852 = vmatpush.bf16.msrb.mxu1 %v2880_v43  ;;  %v3731_v43 = vld [vmem:[#allocation8 + $0x254] sm:$0xf]  ;;  %v3680_v4 = vld [vmem:[#allocation8 + $0xb4] sm:$0xf0]  ;;  %v2889_v7 = vld [vmem:[#allocation8 + $0x208] sm:$0xf0] }
  0x61   :  { %866 = vmatpush.bf16.msrb.mxu2 %v2692_v44  ;;  %v2768_v44 = vor.u32 %v3692_v42, %v2767_v41  ;;  %v2940_v46 = vor.u32 %v3731_v43, %v2937_v45  ;;  %v2892_v8 = vor.u32 %v3719_v5, %v2889_v7  ;;  %v2673_v13 = vld [vmem:[#allocation8 + $0x58] sm:$0xf0]  ;;  %v2695_v15 = vld [vmem:[#allocation8 + $0x70] sm:$0xf]  ;;  %v3713_v17 = vld [vmem:[#allocation8 + $0x1c4] sm:$0xf] }
  0x62   :  { %880 = vmatpush.bf16.msrb.mxu3 %v2884_v48  ;;  %v3740_v48 = vld [vmem:[#allocation8 + $0x294] sm:$0xf0]  ;;  %v2865_v19 = vld [vmem:[#allocation8 + $0x1d8] sm:$0xf0]  ;;  %v2887_v21 = vld [vmem:[#allocation8 + $0x1f0] sm:$0xf] }
  0x63   :  { %839 = vmatpush.bf16.msrb.mxu0 %v2664_v55  ;;  %v2960_v50 = vor.u32 %v3740_v48, %v2959_v47  ;;  %v3686_v55 = vld [vmem:[#allocation8 + $0xe4] sm:$0xf0]  ;;  %v2868_v20 = vor.u32 %v3713_v17, %v2865_v19  ;;  %v2649_v25 = vld [vmem:[#allocation8 + $0x28] sm:$0xf0]  ;;  %v3668_v28 = vld [vmem:[#allocation8 + $0x54] sm:$0xf0] }
  0x64   :  { %853 = vmatpush.bf16.msrb.mxu1 %v2856_v58  ;;  %v2744_v56 = vor.u32 %v3686_v55, %v2743_v53  ;;  %v3725_v58 = vld [vmem:[#allocation8 + $0x224] sm:$0xf]  ;;  %v3707_v29 = vld [vmem:[#allocation8 + $0x194] sm:$0xf]  ;;  %v2841_v31 = vld [vmem:[#allocation8 + $0x1a8] sm:$0xf0] }
  0x65   :  { %867 = vmatpush.bf16.msrb.mxu2 %v2668_v59  ;;  %v2913_v59 = vld [vmem:[#allocation8 + $0x238] sm:$0xf0]  ;;  %v2647_v36 = vld [vmem:[#allocation8 + $0x10] sm:$0xf]  ;;  %v3662_v37 = vld [vmem:[#allocation8 + $0x24] sm:$0xf0] }
  0x66   :  { %881 = vmatpush.bf16.msrb.mxu3 %v2860_v63  ;;  %v2916_v60 = vor.u32 %v3725_v58, %v2913_v59  ;;  %v2936_v63 = vor.u32 %v3734_v62, %v2935_v61  ;;  %v2839_v39 = vld [vmem:[#allocation8 + $0x190] sm:$0xf]  ;;  %v4353_v48 = vld [vmem:[#allocation9] sm:$0x3f] }
  0x67   :  { %840 = vmatpush.bf16.msrb.mxu0 %v2640_v6  ;;  %v2720_v6 = vor.u32 %v3680_v4, %v2719_v3  ;;  %v287_v49 = vperm.slane %v4353_v48, 2  ;;  %v285_v53 = vperm.slane %v4353_v48, 0  ;;  %v286_v55 = vperm.slane %v4353_v48, 1  ;;  %v947_v61 = vld [vmem:[#allocation6 + $0x10] sm:$0xff]  ;;  %v948_v3 = vld [vmem:[#allocation6 + $0x18] sm:$0xff]  ;;  %v945_v5 = vld [vmem:[#allocation6] sm:$0xff] }
  0x68   :  { %854 = vmatpush.bf16.msrb.mxu1 %v2832_v9  ;;  %v2911_v9 = vld [vmem:[#allocation8 + $0x220] sm:$0xf] }
  0x69   :  { %868 = vmatpush.bf16.msrb.mxu2 %v2644_v10  ;;  %v3728_v10 = vld [vmem:[#allocation8 + $0x234] sm:$0xf0] }
  0x6a   :  { %882 = vmatpush.bf16.msrb.mxu3 %v2836_v11  ;;  %841 = vmatmul.bf16.vlgmr.msrb.gmra.mxu0 %v4337_v54  ;;  %v3665_v11 = vld [vmem:[#allocation8 + $0x44] sm:$0xf] }
  0x6b   :  { %855 = vmatmul.bf16.vlgmr.msrb.gmra.mxu1 %v4339_v57  ;;  %889 = vmatpush.bf16.msra.mxu0 %v2816_v22  ;;  %v2676_v14 = vor.u32 %v3665_v11, %v2673_v13  ;;  %v3722_v22 = vld [vmem:[#allocation8 + $0x204] sm:$0xf0] }
  0x6c   :  { %869 = vmatmul.bf16.vlgmr.msrb.gmra.mxu2 %v4337_v54  ;;  %903 = vmatpush.bf16.msra.mxu1 %v3008_v24  ;;  %v2888_v24 = vor.u32 %v3722_v22, %v2887_v21 }
  0x6d   :  { %917 = vmatpush.bf16.msra.mxu2 %v2820_v12  ;;  %883 = vmatmul.bf16.vlgmr.msrb.gmra.mxu3 %v4339_v57  ;;  %v2912_v12 = vor.u32 %v3728_v10, %v2911_v9 }
  0x6e   :  { %931 = vmatpush.bf16.msra.mxu3 %v3012_v16  ;;  %v3674_v16 = vld [vmem:[#allocation8 + $0x84] sm:$0xf0] }
  0x6f   :  { %890 = vmatpush.bf16.msra.mxu0 %v2792_v32  ;;  %v2696_v18 = vor.u32 %v3674_v16, %v2695_v15  ;;  %v2844_v32 = vor.u32 %v3707_v29, %v2841_v31 }
  0x70   :  { %904 = vmatpush.bf16.msra.mxu1 %v2984_v38  ;;  %v2648_v38 = vor.u32 %v3662_v37, %v2647_v36 }
  0x71   :  { %918 = vmatpush.bf16.msra.mxu2 %v2796_v23  ;;  %v3659_v23 = vld [vmem:[#allocation8 + $0x14] sm:$0xf] }
  0x72   :  { %932 = vmatpush.bf16.msra.mxu3 %v2988_v27  ;;  %v2652_v26 = vor.u32 %v3659_v23, %v2649_v25  ;;  %v2671_v27 = vld [vmem:[#allocation8 + $0x40] sm:$0xf] }
  0x73   :  { %891 = vmatpush.bf16.msra.mxu0 %v2768_v44  ;;  %v2672_v30 = vor.u32 %v3668_v28, %v2671_v27 }
  0x74   :  { %905 = vmatpush.bf16.msra.mxu1 %v2960_v50 }
  0x75   :  { %919 = vmatpush.bf16.msra.mxu2 %v2772_v33  ;;  %v2863_v33 = vld [vmem:[#allocation8 + $0x1c0] sm:$0xf] }
  0x76   :  { %933 = vmatpush.bf16.msra.mxu3 %v2964_v34  ;;  %v3716_v34 = vld [vmem:[#allocation8 + $0x1d4] sm:$0xf0] }
  0x77   :  { %892 = vmatpush.bf16.msra.mxu0 %v2744_v56  ;;  %v2864_v35 = vor.u32 %v3716_v34, %v2863_v33 }
  0x78   :  { %906 = vmatpush.bf16.msra.mxu1 %v2936_v63 }
  0x79   :  { %920 = vmatpush.bf16.msra.mxu2 %v2748_v40  ;;  %v3710_v40 = vld [vmem:[#allocation8 + $0x1a4] sm:$0xf0] }
  0x7a   :  { %934 = vmatpush.bf16.msra.mxu3 %v2940_v46  ;;  %v2840_v41 = vor.u32 %v3710_v40, %v2839_v39  ;;  %v289_v39 = vperm.slane %v4353_v48, 4  ;;  %v290_v40 = vperm.slane %v4353_v48, 5 }
  0x7b   :  { %893 = vmatpush.bf16.msra.mxu0 %v2720_v6  ;;  %v946_v6 = vld [vmem:[#allocation6 + $0x8] sm:$0xff] }
  0x7c   :  { %907 = vmatpush.bf16.msra.mxu1 %v2912_v12 }
  0x7d   :  { %921 = vmatpush.bf16.msra.mxu2 %v2724_v52 }
  0x7e   :  { %935 = vmatpush.bf16.msra.mxu3 %v2916_v60 }
  0x7f   :  { %894 = vmatpush.bf16.msra.mxu0 %v2696_v18 }
  0x80   :  { %908 = vmatpush.bf16.msra.mxu1 %v2888_v24 }
  0x81   :  { %922 = vmatpush.bf16.msra.mxu2 %v2700_v2 }
  0x82   :  { %936 = vmatpush.bf16.msra.mxu3 %v2892_v8 }
  0x83   :  { %895 = vmatpush.bf16.msra.mxu0 %v2672_v30 }
  0x84   :  { %909 = vmatpush.bf16.msra.mxu1 %v2864_v35 }
  0x85   :  { %923 = vmatpush.bf16.msra.mxu2 %v2676_v14 }
  0x86   :  { %937 = vmatpush.bf16.msra.mxu3 %v2868_v20 }
  0x87   :  { %896 = vmatpush.bf16.msra.mxu0 %v2648_v38 }
  0x88   :  { %910 = vmatpush.bf16.msra.mxu1 %v2840_v41 }
  0x89   :  { %924 = vmatpush.bf16.msra.mxu2 %v2652_v26 }
  0x8a   :  { %938 = vmatpush.bf16.msra.mxu3 %v2844_v32  ;;  %897 = vmatmul.bf16.vlgmr.msra.gmra.mxu0 %v4337_v54 }
  0x8b   :  { %911 = vmatmul.bf16.vlgmr.msra.gmra.mxu1 %v4339_v57 }
  0x8c   :  { %925 = vmatmul.bf16.vlgmr.msra.gmra.mxu2 %v4337_v54 }
  0x8d   :  { %939 = vmatmul.bf16.vlgmr.msra.gmra.mxu3 %v4339_v57  ;;  %v288_v57 = vperm.slane %v4353_v48, 3 }
  0xc7   :  { %v786_v42 = vpop.f32.mrf.mxu0 }
  0xc8   :  { %v800_v43 = vpop.f32.mrf.mxu1  ;;  %v787_v56 = vadd.f32 %v786_v42, %v285_v53 }
  0xca   :  { %v801_v1 = vadd.f32 %v800_v43, %v787_v56 }
  0xcc   :  { %v949_v11 = vadd.f32 %v945_v5, %v801_v1 }
  0xce   :  { %v959_v21 = vmul.f32 0.088388346, %v949_v11 }
  0xcf   :  { %v814_v44 = vpop.f32.mrf.mxu2  ;;  %v788_v46 = vpop.f32.mrf.mxu0 }
  0xd0   :  { %v828_v45 = vpop.f32.mrf.mxu3  ;;  %v802_v47 = vpop.f32.mrf.mxu1  ;;  %v815_v58 = vadd.f32 %v814_v44, %v286_v55  ;;  %v789_v13 = vadd.f32 %v788_v46, %v285_v53 }
  0xd2   :  { %v829_v2 = vadd.f32 %v828_v45, %v815_v58  ;;  %v803_v23 = vadd.f32 %v802_v47, %v789_v13 }
  0xd4   :  { %v950_v12 = vadd.f32 %v946_v6, %v829_v2  ;;  %v953_v30 = vadd.f32 %v945_v5, %v803_v23 }
  0xd6   :  { %v960_v22 = vmul.f32 0.088388346, %v950_v12  ;;  %v961_v34 = vmul.f32 0.088388346, %v953_v30 }
  0xd7   :  { %v816_v50 = vpop.f32.mrf.mxu2 }
  0xd8   :  { %v830_v51 = vpop.f32.mrf.mxu3  ;;  %v817_v14 = vadd.f32 %v816_v50, %v286_v55  ;;  %v963_v29 = vpack.c.bf16 %v960_v22, %v959_v21 }
  0xda   :  { %v831_v24 = vadd.f32 %v830_v51, %v817_v14  ;;  %v1060_v37 = vrot.slane %v963_v29, 4 }
  0xdc   :  { %v954_v31 = vadd.f32 %v946_v6, %v831_v24 }
  0xde   :  { %v962_v35 = vmul.f32 0.088388346, %v954_v31 }
  0xe0   :  { %v964_v36 = vpack.c.bf16 %v962_v35, %v961_v34  ;;  %v3075_v34 = vld [vmem:[#allocation11 + $0x70] sm:$0xf]  ;;  %v3768_v35 = vld [vmem:[#allocation11 + $0x74] sm:$0xf0] }
  0xe2   :  { %v1079_v38 = vrot.slane %v964_v36, 4 }
  0xe7   :  { %v842_v52 = vpop.f32.mrf.mxu0 }
  0xe8   :  { %v843_v54 = vadd.f32 %v842_v52, %v287_v49  ;;  %v856_v59 = vpop.f32.mrf.mxu1 }
  0xea   :  { %v857_v60 = vadd.f32 %v856_v59, %v843_v54 }
  0xec   :  { %v951_v7 = vadd.f32 %v947_v61, %v857_v60 }
  0xef   :  { %v870_v62 = vpop.f32.mrf.mxu2  ;;  %v844_v4 = vpop.f32.mrf.mxu0 }
  0xf0   :  { %v871_v63 = vadd.f32 %v870_v62, %v288_v57  ;;  %v884_v0 = vpop.f32.mrf.mxu3  ;;  %v845_v10 = vadd.f32 %v844_v4, %v287_v49  ;;  %v858_v16 = vpop.f32.mrf.mxu1 }
  0xf2   :  { %v885_v8 = vadd.f32 %v884_v0, %v871_v63  ;;  %v859_v19 = vadd.f32 %v858_v16, %v845_v10 }
  0xf4   :  { %v952_v9 = vadd.f32 %v948_v3, %v885_v8  ;;  %v955_v27 = vadd.f32 %v947_v61, %v859_v19 }
  0xf6   :  { %v965_v15 = vpack.c.bf16 %v952_v9, %v951_v7 }
  0xf7   :  { %v872_v17 = vpop.f32.mrf.mxu2 }
  0xf8   :  { %v1063_v18 = vrot.slane %v965_v15, 4  ;;  %v873_v20 = vadd.f32 %v872_v17, %v288_v57  ;;  %974 = vmatpush.bf16.xpose.msrb.mxu0 %v965_v15  ;;  %v886_v25 = vpop.f32.mrf.mxu3 }
  0xfa   :  { %v887_v26 = vadd.f32 %v886_v25, %v873_v20 }
  0xfc   :  { %v956_v28 = vadd.f32 %v948_v3, %v887_v26 }
  0xfe   :  { %v966_v32 = vpack.c.bf16 %v956_v28, %v955_v27 }
  0xff   :  { %975 = vmatmul.bf16.vlgmr.msrb.gmra.mxu0 %v963_v29 }
 0x100   :  { %1072 = vmatpush.bf16.xpose.msra.mxu0 %v1063_v18  ;;  %v1082_v33 = vrot.slane %v966_v32, 4  ;;  %987 = vmatpush.bf16.xpose.msrb.mxu1 %v966_v32 }
 0x107   :  { %988 = vmatmul.bf16.vlgmr.msrb.gmra.mxu1 %v964_v36  ;;  %v898_v41 = vpop.f32.mrf.mxu0  ;;  %v3076_v36 = vor.u32 %v3768_v35, %v3075_v34  ;;  %v3756_v35 = vld [vmem:[#allocation11 + $0x14] sm:$0xf0] }
 0x108   :  { %1091 = vmatpush.bf16.xpose.msra.mxu1 %v1082_v33  ;;  %v899_v42 = vadd.f32 %v898_v41, %v289_v39  ;;  %v912_v45 = vpop.f32.mrf.mxu1 }
 0x109   :  { %1369 = vmatpush.bf16.msrb.mxu0 %v3076_v36  ;;  %v3123_v36 = vld [vmem:[#allocation11 + $0xd0] sm:$0xf] }
 0x10a   :  { %v913_v47 = vadd.f32 %v912_v45, %v899_v42  ;;  %v3059_v45 = vld [vmem:[#allocation11 + $0x50] sm:$0xf] }
 0x10f   :  { %1073 = vmatmul.bf16.vlgmr.msra.gmra.mxu0 %v1060_v37  ;;  %v926_v43 = vpop.f32.mrf.mxu2  ;;  %v900_v50 = vpop.f32.mrf.mxu0  ;;  %v3067_v37 = vld [vmem:[#allocation11 + $0x60] sm:$0xf] }
 0x110   :  { %v927_v44 = vadd.f32 %v926_v43, %v290_v40  ;;  %v940_v46 = vpop.f32.mrf.mxu3  ;;  %v901_v52 = vadd.f32 %v900_v50, %v289_v39  ;;  %v914_v54 = vpop.f32.mrf.mxu1  ;;  %v3767_v39 = vld [vmem:[#allocation11 + $0x74] sm:$0xf] }
 0x112   :  { %v941_v49 = vadd.f32 %v940_v46, %v927_v44  ;;  %v915_v57 = vadd.f32 %v914_v54, %v901_v52  ;;  %v3764_v46 = vld [vmem:[#allocation11 + $0x54] sm:$0xf0]  ;;  %v3139_v52 = vld [vmem:[#allocation11 + $0xf0] sm:$0xf] }
 0x114   :  { %v957_v51 = vpack.c.bf16 %v941_v49, %v913_v47  ;;  %v3765_v49 = vld [vmem:[#allocation11 + $0x64] sm:$0xf] }
 0x116   :  { %v1122_v59 = vrot.slane %v957_v51, 4  ;;  %v1023_v48 = vsel %vm1021_vm0, %v957_v51, 0  ;;  %v3069_v51 = vld [vmem:[#allocation11 + $0x68] sm:$0xf0] }
 0x117   :  { %1092 = vmatmul.bf16.vlgmr.msra.gmra.mxu1 %v1079_v38  ;;  %v928_v53 = vpop.f32.mrf.mxu2  ;;  %1032 = vmatpush.bf16.msrb.mxu2 %v1023_v48  ;;  %v3766_v38 = vld [vmem:[#allocation11 + $0x64] sm:$0xf0]  ;;  %v3783_v48 = vld [vmem:[#allocation11 + $0xf4] sm:$0xf] }
 0x118   :  { %v929_v55 = vadd.f32 %v928_v53, %v290_v40  ;;  %v942_v56 = vpop.f32.mrf.mxu3  ;;  %v1127_v63 = vsel %vm1021_vm0, %v1122_v59, 0  ;;  %v3077_v40 = vld [vmem:[#allocation11 + $0x78] sm:$0xf0]  ;;  %v3068_v42 = vor.u32 %v3766_v38, %v3067_v37  ;;  %v3784_v53 = vld [vmem:[#allocation11 + $0xf4] sm:$0xf0] }
 0x119   :  { %v3080_v47 = vor.u32 %v3767_v39, %v3077_v40  ;;  %v3140_v54 = vor.u32 %v3784_v53, %v3139_v52  ;;  %v3763_v59 = vld [vmem:[#allocation11 + $0x54] sm:$0xf]  ;;  %v3029_v40 = vld [vmem:[#allocation11 + $0x18] sm:$0xf0]  ;;  %v3021_v52 = vld [vmem:[#allocation11 + $0x8] sm:$0xf0] }
 0x11a   :  { %v943_v58 = vadd.f32 %v942_v56, %v929_v55  ;;  %1370 = vmatpush.bf16.msrb.mxu0 %v3068_v42  ;;  %v3060_v55 = vor.u32 %v3764_v46, %v3059_v45  ;;  %v3762_v56 = vld [vmem:[#allocation11 + $0x44] sm:$0xf0]  ;;  %v3755_v39 = vld [vmem:[#allocation11 + $0x14] sm:$0xf]  ;;  %v3019_v45 = vld [vmem:[#allocation11] sm:$0xf] }
 0x11b   :  { %1136 = vmatpush.bf16.msra.mxu2 %v1127_v63  ;;  %1383 = vmatpush.bf16.msrb.mxu1 %v3140_v54  ;;  %v3032_v42 = vor.u32 %v3755_v39, %v3029_v40  ;;  %v3754_v46 = vld [vmem:[#allocation11 + $0x4] sm:$0xf0]  ;;  %v3777_v54 = vld [vmem:[#allocation11 + $0xc4] sm:$0xf]  ;;  %v3956_v39 = vld [vmem:[#allocation3] sm:$0xff] }
 0x11c   :  { %v958_v60 = vpack.c.bf16 %v943_v58, %v915_v57  ;;  %v3051_v57 = vld [vmem:[#allocation11 + $0x40] sm:$0xf]  ;;  %v3072_v58 = vor.u32 %v3765_v49, %v3069_v51  ;;  %v3020_v49 = vor.u32 %v3754_v46, %v3019_v45  ;;  %v3753_v51 = vld [vmem:[#allocation11 + $0x4] sm:$0xf] }
 0x11d   :  { %v3052_v63 = vor.u32 %v3762_v56, %v3051_v57  ;;  %v3117_v57 = vld [vmem:[#allocation11 + $0xc8] sm:$0xf0] }
 0x11e   :  { %v1143_v61 = vrot.slane %v958_v60, 4  ;;  %v1042_v62 = vsel %vm1021_vm0, %v958_v60, 0  ;;  %v3061_v60 = vld [vmem:[#allocation11 + $0x58] sm:$0xf0]  ;;  %1371 = vmatpush.bf16.msrb.mxu0 %v3060_v55  ;;  %v3024_v55 = vor.u32 %v3753_v51, %v3021_v52  ;;  %v3120_v56 = vor.u32 %v3777_v54, %v3117_v57  ;;  %v3958_v52 = vld [vmem:[#allocation3 + $0x10] sm:$0xff] }
 0x11f   :  { %1051 = vmatpush.bf16.msrb.mxu3 %v1042_v62 }
 0x120   :  { %v1148_v0 = vsel %vm1021_vm0, %v1143_v61, 0  ;;  %v3141_v61 = vld [vmem:[#allocation11 + $0xf8] sm:$0xf0] }
 0x122   :  { %1372 = vmatpush.bf16.msrb.mxu0 %v3052_v63  ;;  %v3099_v63 = vld [vmem:[#allocation11 + $0xa0] sm:$0xf] }
 0x123   :  { %1157 = vmatpush.bf16.msra.mxu3 %v1148_v0 }
 0x17c   :  { %v976_v1 = vpop.f32.mrf.mxu0 }
 0x17d   :  { %v994_v2 = vsel %vm993_vm1, %v976_v1, -inf }
 0x17e   :  { %995 = vmax.xlane.f32.xlu0 %v994_v2  ;;  %v3043_v2 = vld [vmem:[#allocation11 + $0x30] sm:$0xf] }
 0x184   :  { %v978_v3 = vpop.f32.mrf.mxu0  ;;  %v989_v4 = vpop.f32.mrf.mxu1 }
 0x185   :  { %v997_v5 = vsel %vm993_vm1, %v989_v4, -inf  ;;  %v3760_v3 = vld [vmem:[#allocation11 + $0x34] sm:$0xf0] }
 0x186   :  { %998 = vmax.xlane.f32.xlu0 %v997_v5  ;;  %v3144_v5 = vor.u32 %v3783_v48, %v3141_v61  ;;  %v3109_v61 = vld [vmem:[#allocation11 + $0xb8] sm:$0xf0] }
 0x18c   :  { %v991_v6 = vpop.f32.mrf.mxu1  ;;  %v1074_v7 = vpop.f32.mrf.mxu0 }
 0x18d   :  { %v1097_v8 = vsel %vm993_vm1, %v1074_v7, -inf }
 0x18e   :  { %1098 = vmax.xlane.f32.xlu1 %v1097_v8  ;;  %v3053_v8 = vld [vmem:[#allocation11 + $0x48] sm:$0xf0] }
 0x194   :  { %v1076_v9 = vpop.f32.mrf.mxu0  ;;  %v1093_v10 = vpop.f32.mrf.mxu1 }
 0x195   :  { %v1100_v11 = vsel %vm993_vm1, %v1093_v10, -inf  ;;  %v3044_v9 = vor.u32 %v3760_v3, %v3043_v2  ;;  %v3101_v3 = vld [vmem:[#allocation11 + $0xa8] sm:$0xf0] }
 0x196   :  { %1101 = vmax.xlane.f32.xlu1 %v1100_v11  ;;  %v3759_v11 = vld [vmem:[#allocation11 + $0x34] sm:$0xf] }
 0x197   :  { %1373 = vmatpush.bf16.msrb.mxu0 %v3044_v9 }
 0x19c   :  { %v1095_v12 = vpop.f32.mrf.mxu1 }
 0x19d   :  { %v3045_v12 = vld [vmem:[#allocation11 + $0x38] sm:$0xf0] }
 0x1f1   :  { %v996_v13 = vpop.xlane.xlu0 %995 }
 0x1f2   :  { %v1000_v14 = vsub.f32 %v976_v1, %v996_v13 }
 0x1f4   :  { %v1002_v15 = vmul.f32 1.442695, %v1000_v14 }
 0x1f6   :  { %3930 = vpow2.f32 %v1002_v15 }
 0x1f9   :  { %v999_v16 = vpop.xlane.xlu0 %998 }
 0x1fa   :  { %v1001_v17 = vsub.f32 %v989_v4, %v999_v16  ;;  %v3064_v4 = vor.u32 %v3763_v59, %v3061_v60  ;;  %v3048_v16 = vor.u32 %v3759_v11, %v3045_v12  ;;  %v3776_v59 = vld [vmem:[#allocation11 + $0xb4] sm:$0xf0]  ;;  %v3775_v60 = vld [vmem:[#allocation11 + $0xb4] sm:$0xf]  ;;  %v3083_v11 = vld [vmem:[#allocation11 + $0x80] sm:$0xf] }
 0x1fb   :  { %v3770_v12 = vld [vmem:[#allocation11 + $0x84] sm:$0xf0] }
 0x1fc   :  { %v3931_v18 = vpop.eup %3930  ;;  %v1004_v19 = vmul.f32 1.442695, %v1001_v17 }
 0x1fd   :  { %v1006_v20 = vsel %vm993_vm1, %v3931_v18, 0.0 }
 0x1fe   :  { %3932 = vpow2.f32 %v1004_v19  ;;  %1007 = vadd.xlane.f32.xlu2 %v1006_v20 }
 0x201   :  { %v1099_v21 = vpop.xlane.xlu1 %1098 }
 0x202   :  { %v1103_v22 = vsub.f32 %v1074_v7, %v1099_v21  ;;  %v3761_v7 = vld [vmem:[#allocation11 + $0x44] sm:$0xf]  ;;  %v3035_v21 = vld [vmem:[#allocation11 + $0x20] sm:$0xf] }
 0x204   :  { %v3933_v23 = vpop.eup %3932  ;;  %v1105_v24 = vmul.f32 1.442695, %v1103_v22  ;;  %v3758_v22 = vld [vmem:[#allocation11 + $0x24] sm:$0xf0] }
 0x205   :  { %v1009_v25 = vsel %vm993_vm1, %v3933_v23, 0.0 }
 0x206   :  { %3934 = vpow2.f32 %v1105_v24  ;;  %1010 = vadd.xlane.f32.xlu2 %v1009_v25  ;;  %v3036_v24 = vor.u32 %v3758_v22, %v3035_v21  ;;  %v3782_v25 = vld [vmem:[#allocation11 + $0xe4] sm:$0xf0] }
 0x208   :  { %1374 = vmatpush.bf16.msrb.mxu0 %v3036_v24 }
 0x209   :  { %v1102_v26 = vpop.xlane.xlu1 %1101 }
 0x20a   :  { %v1104_v27 = vsub.f32 %v1093_v10, %v1102_v26  ;;  %v3056_v10 = vor.u32 %v3761_v7, %v3053_v8  ;;  %v3757_v26 = vld [vmem:[#allocation11 + $0x24] sm:$0xf]  ;;  %v3771_v7 = vld [vmem:[#allocation11 + $0x94] sm:$0xf]  ;;  %v3093_v8 = vld [vmem:[#allocation11 + $0x98] sm:$0xf0] }
 0x20c   :  { %v4367_v28 = vpop.eup %3934  ;;  %v1107_v29 = vmul.f32 1.442695, %v1104_v27  ;;  %v3037_v27 = vld [vmem:[#allocation11 + $0x28] sm:$0xf0] }
 0x20d   :  { %v1109_v30 = vsel %vm993_vm1, %v4367_v28, 0.0 }
 0x20e   :  { %3936 = vpow2.f32 %v1107_v29  ;;  %1110 = vadd.xlane.f32.xlu0 %v1109_v30  ;;  %v3040_v29 = vor.u32 %v3757_v26, %v3037_v27  ;;  %v3781_v30 = vld [vmem:[#allocation11 + $0xe4] sm:$0xf]  ;;  %v1203_v27 = vld [vmem:[%s4469_s5] sm:$0x3] }
 0x214   :  { %v4371_v31 = vpop.eup %3936 }
 0x215   :  { %v1112_v32 = vsel %vm993_vm1, %v4371_v31, 0.0 }
 0x216   :  { %1113 = vadd.xlane.f32.xlu1 %v1112_v32  ;;  %v3133_v32 = vld [vmem:[#allocation11 + $0xe8] sm:$0xf0] }
 0x217   :  { %v3136_v34 = vor.u32 %v3781_v30, %v3133_v32 }
 0x271   :  { %v1008_v33 = vpop.xlane.xlu2 %1007 }
 0x272   :  { %3938 = vrcp.f32 %v1008_v33  ;;  %v3027_v33 = vld [vmem:[#allocation11 + $0x10] sm:$0xf] }
 0x273   :  { %v3028_v37 = vor.u32 %v3756_v35, %v3027_v33  ;;  %v1206_v33 = vperm.slane %v1203_v27, 1 }
 0x275   :  { %1375 = vmatpush.bf16.msrb.mxu0 %v3028_v37 }
 0x278   :  { %v3939_v41 = vpop.eup %3938 }
 0x279   :  { %v1014_v43 = vmul.f32 %v3939_v41, %v3931_v18  ;;  %v1011_v44 = vpop.xlane.xlu2 %1010  ;;  %v3779_v41 = vld [vmem:[#allocation11 + $0xd4] sm:$0xf]  ;;  %1376 = vmatpush.bf16.msrb.mxu0 %v3020_v49 }
 0x27a   :  { %3940 = vrcp.f32 %v1011_v44 }
 0x27b   :  { %v1016_v50 = vpack.c.bf16 %v1014_v43, %v1014_v43  ;;  %v3125_v43 = vld [vmem:[#allocation11 + $0xd8] sm:$0xf0] }
 0x27c   :  { %v3128_v44 = vor.u32 %v3779_v41, %v3125_v43  ;;  %v3957_v41 = vld [vmem:[#allocation3 + $0x8] sm:$0xff] }
 0x27d   :  { %3013 = vmatmul.msk.bf16.vlgmr.msrb.gmra.mxu2 %vm993_vm1, %v1016_v50  ;;  %v3778_v50 = vld [vmem:[#allocation11 + $0xc4] sm:$0xf0] }
 0x27e   :  { %1397 = vmatpush.bf16.msrb.mxu2 %v3080_v47  ;;  %v3115_v47 = vld [vmem:[#allocation11 + $0xc0] sm:$0xf] }
 0x27f   :  { %v3116_v53 = vor.u32 %v3778_v50, %v3115_v47 }
 0x280   :  { %v3941_v62 = vpop.eup %3940 }
 0x281   :  { %v1015_v0 = vmul.f32 %v3941_v62, %v3933_v23  ;;  %v1111_v1 = vpop.xlane.xlu0 %1110  ;;  %v3131_v23 = vld [vmem:[#allocation11 + $0xe0] sm:$0xf]  ;;  %v3112_v62 = vor.u32 %v3775_v60, %v3109_v61  ;;  %v3815_v61 = vld [vmem:[#allocation15 + $0xec] sm:$0xf0] }
 0x282   :  { %3942 = vrcp.f32 %v1111_v1  ;;  %1398 = vmatpush.bf16.msrb.mxu2 %v3072_v58  ;;  %v3107_v58 = vld [vmem:[#allocation11 + $0xb0] sm:$0xf]  ;;  %v3773_v1 = vld [vmem:[#allocation11 + $0xa4] sm:$0xf] }
 0x283   :  { %v1017_v6 = vpack.c.bf16 %v1015_v0, %v1015_v0  ;;  %v3108_v48 = vor.u32 %v3776_v59, %v3107_v58  ;;  %v3774_v0 = vld [vmem:[#allocation11 + $0xa4] sm:$0xf0] }
 0x284   :  { %v3100_v2 = vor.u32 %v3774_v0, %v3099_v63  ;;  %v3847_v0 = vld [vmem:[#allocation15 + $0x1ec] sm:$0xf0] }
 0x285   :  { %3014 = vmatmul.msk.bf16.vlgmr.msrb.gmra.mxu3 %vm993_vm1, %v1017_v6  ;;  %v3772_v6 = vld [vmem:[#allocation11 + $0x94] sm:$0xf0] }
 0x286   :  { %1399 = vmatpush.bf16.msrb.mxu2 %v3064_v4  ;;  %1411 = vmatpush.bf16.msrb.mxu3 %v3144_v5  ;;  %v3104_v4 = vor.u32 %v3773_v1, %v3101_v3  ;;  %v3091_v5 = vld [vmem:[#allocation11 + $0x90] sm:$0xf]  ;;  %v3813_v1 = vld [vmem:[#allocation15 + $0xe4] sm:$0xf] }
 0x287   :  { %v3092_v9 = vor.u32 %v3772_v6, %v3091_v5  ;;  %v3845_v5 = vld [vmem:[#allocation15 + $0x1e4] sm:$0xf]  ;;  %v3389_v6 = vld [vmem:[#allocation15 + $0x1f0] sm:$0xf0] }
 0x288   :  { %v3943_v13 = vpop.eup %3942 }
 0x289   :  { %v1117_v14 = vmul.f32 %v3943_v13, %v4367_v28  ;;  %v1114_v15 = vpop.xlane.xlu1 %1113  ;;  %v3132_v28 = vor.u32 %v3782_v25, %v3131_v23  ;;  %v3769_v13 = vld [vmem:[#allocation11 + $0x84] sm:$0xf] }
 0x28a   :  { %3944 = vrcp.f32 %v1114_v15  ;;  %1400 = vmatpush.bf16.msrb.mxu2 %v3056_v10  ;;  %1412 = vmatpush.bf16.msrb.mxu3 %v3136_v34  ;;  %v3096_v10 = vor.u32 %v3771_v7, %v3093_v8  ;;  %v3085_v15 = vld [vmem:[#allocation11 + $0x88] sm:$0xf0]  ;;  %v3243_v7 = vld [vmem:[#allocation15 + $0xc0] sm:$0xf]  ;;  %v3392_v8 = vor.u32 %v3845_v5, %v3389_v6  ;;  %v3829_v6 = vld [vmem:[#allocation15 + $0x164] sm:$0xf] }
 0x28b   :  { %v1119_v17 = vpack.c.bf16 %v1117_v14, %v1117_v14  ;;  %1384 = vmatpush.bf16.msrb.mxu1 %v3132_v28  ;;  %v3084_v14 = vor.u32 %v3770_v12, %v3083_v11  ;;  %v3843_v11 = vld [vmem:[#allocation15 + $0x1cc] sm:$0xf0] }
 0x28d   :  { %3015 = vmatmul.msk.bf16.vlgmr.msra.gmra.mxu2 %vm993_vm1, %v1119_v17 }
 0x28e   :  { %1401 = vmatpush.bf16.msrb.mxu2 %v3048_v16  ;;  %1413 = vmatpush.bf16.msrb.mxu3 %v3128_v44  ;;  %v3088_v16 = vor.u32 %v3769_v13, %v3085_v15  ;;  %v3245_v15 = vld [vmem:[#allocation15 + $0xd0] sm:$0xf0] }
 0x290   :  { %v3945_v18 = vpop.eup %3944 }
 0x291   :  { %v1118_v19 = vmul.f32 %v3945_v18, %v4371_v31  ;;  %v3780_v31 = vld [vmem:[#allocation11 + $0xd4] sm:$0xf0] }
 0x292   :  { %1402 = vmatpush.bf16.msrb.mxu2 %v3040_v29  ;;  %v3124_v38 = vor.u32 %v3780_v31, %v3123_v36  ;;  %1414 = vmatpush.bf16.msrb.mxu3 %v3120_v56  ;;  %v1205_v29 = vperm.slane %v1203_v27, 0  ;;  %v4227_v56 = vmov 256.0  }
 0x293   :  { %v1120_v20 = vpack.c.bf16 %v1118_v19, %v1118_v19  ;;  %3946 = vrcp.f32 %v4227_v56 }
 0x294   :  { %1385 = vmatpush.bf16.msrb.mxu1 %v3124_v38 }
 0x295   :  { %3016 = vmatmul.msk.bf16.vlgmr.msra.gmra.mxu3 %vm993_vm1, %v1120_v20 }
 0x296   :  { %1403 = vmatpush.bf16.msrb.mxu2 %v3032_v42  ;;  %1415 = vmatpush.bf16.msrb.mxu3 %v3112_v62  ;;  %v3387_v62 = vld [vmem:[#allocation15 + $0x1e0] sm:$0xf] }
 0x297   :  { %v3388_v3 = vor.u32 %v3847_v0, %v3387_v62  ;;  %v3799_v62 = vld [vmem:[#allocation15 + $0x6c] sm:$0xf0] }
 0x298   :  { %1386 = vmatpush.bf16.msrb.mxu1 %v3116_v53 }
 0x299   :  { %v3947_v58 = vpop.eup %3946 }
 0x29a   :  { %1404 = vmatpush.bf16.msrb.mxu2 %v3024_v55  ;;  %1416 = vmatpush.bf16.msrb.mxu3 %v3104_v4  ;;  %v3959_v55 = vld [vmem:[#allocation3 + $0x18] sm:$0xff]  ;;  %v1436_v59 = vmul.f32 256.0, %v3947_v58  ;;  %vm1440_vm2 = vweird.f32 %v3947_v58 }
 0x29c   :  { %1387 = vmatpush.bf16.msrb.mxu1 %v3108_v48  ;;  %v1437_v60 = vsub.f32 1.0, %v1436_v59  ;;  %v3259_v48 = vld [vmem:[#allocation15 + $0xe0] sm:$0xf]  ;;  %v3833_v59 = vld [vmem:[#allocation15 + $0x184] sm:$0xf] }
 0x29d   :  { %v3260_v63 = vor.u32 %v3815_v61, %v3259_v48  ;;  %v3195_v61 = vld [vmem:[#allocation15 + $0x60] sm:$0xf] }
 0x29e   :  { %1417 = vmatpush.bf16.msrb.mxu3 %v3096_v10  ;;  %v3371_v10 = vld [vmem:[#allocation15 + $0x1c0] sm:$0xf]  ;;  %v3196_v0 = vor.u32 %v3799_v62, %v3195_v61  ;;  %v3251_v61 = vld [vmem:[#allocation15 + $0xc8] sm:$0xf]  ;;  %v3812_v62 = vld [vmem:[#allocation15 + $0xd4] sm:$0xf0] }
 0x29f   :  { %1902 = vmatpush.bf16.msra.mxu0 %v3260_v63  ;;  %v3372_v13 = vor.u32 %v3843_v11, %v3371_v10  ;;  %v3323_v63 = vld [vmem:[#allocation15 + $0x160] sm:$0xf]  ;;  %v3795_v10 = vld [vmem:[#allocation15 + $0x4c] sm:$0xf0] }
 0x2a0   :  { %1388 = vmatpush.bf16.msrb.mxu1 %v3100_v2  ;;  %v3261_v2 = vld [vmem:[#allocation15 + $0xf0] sm:$0xf0]  ;;  %v3307_v11 = vld [vmem:[#allocation15 + $0x140] sm:$0xf] }
 0x2a1   :  { %v3264_v4 = vor.u32 %v3813_v1, %v3261_v2  ;;  %v3831_v1 = vld [vmem:[#allocation15 + $0x16c] sm:$0xf0]  ;;  %v3797_v2 = vld [vmem:[#allocation15 + $0x64] sm:$0xf] }
 0x2a2   :  { %1418 = vmatpush.bf16.msrb.mxu3 %v3088_v16  ;;  %v3841_v16 = vld [vmem:[#allocation15 + $0x1c4] sm:$0xf] }
 0x2a3   :  { %1930 = vmatpush.bf16.msra.mxu2 %v3264_v4  ;;  %v3324_v4 = vor.u32 %v3831_v1, %v3323_v63  ;;  %v3379_v1 = vld [vmem:[#allocation15 + $0x1c8] sm:$0xf] }
 0x2a4   :  { %1389 = vmatpush.bf16.msrb.mxu1 %v3092_v9  ;;  %v3811_v9 = vld [vmem:[#allocation15 + $0xcc] sm:$0xf0] }
 0x2a5   :  { %v3244_v12 = vor.u32 %v3811_v9, %v3243_v7  ;;  %v3325_v7 = vld [vmem:[#allocation15 + $0x170] sm:$0xf0]  ;;  %v3179_v9 = vld [vmem:[#allocation15 + $0x40] sm:$0xf] }
 0x2a6   :  { %1944 = vmatpush.bf16.msra.mxu3 %v3392_v8  ;;  %v3328_v8 = vor.u32 %v3829_v6, %v3325_v7  ;;  %v3842_v6 = vld [vmem:[#allocation15 + $0x1cc] sm:$0xf]  ;;  %v3381_v7 = vld [vmem:[#allocation15 + $0x1d8] sm:$0xf0] }
 0x2a7   :  { %1903 = vmatpush.bf16.msra.mxu0 %v3244_v12  ;;  %v3180_v12 = vor.u32 %v3795_v10, %v3179_v9  ;;  %v3384_v9 = vor.u32 %v3842_v6, %v3381_v7  ;;  %v3235_v10 = vld [vmem:[#allocation15 + $0xa8] sm:$0xf]  ;;  %v3792_v7 = vld [vmem:[#allocation15 + $0x34] sm:$0xf0] }
 0x2a8   :  { %1390 = vmatpush.bf16.msrb.mxu1 %v3084_v14  ;;  %v3809_v14 = vld [vmem:[#allocation15 + $0xc4] sm:$0xf] }
 0x2ac   :  { %1916 = vmatpush.bf16.msra.mxu1 %v3388_v3  ;;  %v3197_v3 = vld [vmem:[#allocation15 + $0x70] sm:$0xf0] }
 0x2ad   :  { %v3200_v5 = vor.u32 %v3797_v2, %v3197_v3  ;;  %v3844_v2 = vld [vmem:[#allocation15 + $0x1d4] sm:$0xf0]  ;;  %v3810_v3 = vld [vmem:[#allocation15 + $0xcc] sm:$0xf] }
 0x2b0   :  { %1917 = vmatpush.bf16.msra.mxu1 %v3372_v13  ;;  %v3827_v13 = vld [vmem:[#allocation15 + $0x14c] sm:$0xf0] }
 0x300   :  { %v1034_v17 = vpop.f32.mrf.mxu2 }
 0x308   :  { %v1036_v18 = vpop.f32.mrf.mxu2  ;;  %v1053_v19 = vpop.f32.mrf.mxu3 }
 0x309   :  { %v1169_v20 = vpack.c.bf16 %v1053_v19, %v1034_v17  ;;  %v1438_v17 = vmul.f32 %v3947_v58, %v1437_v60  ;;  %v3248_v18 = vor.u32 %v3809_v14, %v3245_v15  ;;  %v3373_v19 = vld [vmem:[#allocation15 + $0x1d0] sm:$0xf0]  ;;  %v3793_v14 = vld [vmem:[#allocation15 + $0x44] sm:$0xf] }
 0x30a   :  { %v3341_v60 = vld [vmem:[#allocation15 + $0x190] sm:$0xf0] }
 0x30b   :  { %1377 = vmatmul.bf16.vlgmr.msrb.gmra.mxu0 %v1169_v20  ;;  %1405 = vmatmul.bf16.vlgmr.msrb.gmra.mxu2 %v1169_v20  ;;  %v3376_v20 = vor.u32 %v3841_v16, %v3373_v19  ;;  %v3344_v48 = vor.u32 %v3833_v59, %v3341_v60  ;;  %v3181_v15 = vld [vmem:[#allocation15 + $0x50] sm:$0xf0]  ;;  %v3308_v16 = vor.u32 %v3827_v13, %v3307_v11  ;;  %v3846_v59 = vld [vmem:[#allocation15 + $0x1ec] sm:$0xf]  ;;  %v3808_v11 = vld [vmem:[#allocation15 + $0xb4] sm:$0xf0] }
 0x30c   :  { %1931 = vmatpush.bf16.msra.mxu2 %v3248_v18  ;;  %v3825_v18 = vld [vmem:[#allocation15 + $0x144] sm:$0xf]  ;;  %v3309_v19 = vld [vmem:[#allocation15 + $0x150] sm:$0xf0]  ;;  %v3236_v13 = vor.u32 %v3808_v11, %v3235_v10  ;;  %v3790_v11 = vld [vmem:[#allocation15 + $0x2c] sm:$0xf] }
 0x30d   :  { %1945 = vmatpush.bf16.msra.mxu3 %v3376_v20  ;;  %v3312_v20 = vor.u32 %v3825_v18, %v3309_v19 }
 0x310   :  { %v1055_v21 = vpop.f32.mrf.mxu3  ;;  %v1138_v22 = vpop.f32.mrf.mxu2 }
 0x311   :  { %v1439_v21 = vadd.f32 %v3947_v58, %v1438_v17  ;;  %v3184_v17 = vor.u32 %v3793_v14, %v3181_v15  ;;  %v3840_v14 = vld [vmem:[#allocation15 + $0x1b4] sm:$0xf0]  ;;  %v3806_v15 = vld [vmem:[#allocation15 + $0xac] sm:$0xf] }
 0x318   :  { %v1140_v23 = vpop.f32.mrf.mxu2  ;;  %v1159_v24 = vpop.f32.mrf.mxu3 }
 0x319   :  { %v1170_v25 = vpack.c.bf16 %v1159_v24, %v1138_v22  ;;  %v4384_v22 = vsel %vm1440_vm2, %v3947_v58, %v1439_v21  ;;  %v3163_v21 = vld [vmem:[#allocation15 + $0x20] sm:$0xf] }
 0x31b   :  { %1391 = vmatmul.bf16.vlgmr.msrb.gmra.mxu1 %v1170_v25  ;;  %1419 = vmatmul.bf16.vlgmr.msrb.gmra.mxu3 %v1170_v25 }
 0x320   :  { %v1161_v26 = vpop.f32.mrf.mxu3 }
 0x388   :  { %v1378_v28 = vpop.f32.mrf.mxu0 }
 0x389   :  { %v1379_v34 = vadd.f32 %v1378_v28, %v1205_v29 }
 0x38e   :  { %v1406_v30 = vpop.f32.mrf.mxu2 }
 0x38f   :  { %v1407_v35 = vadd.f32 %v1406_v30, %v1206_v33 }
 0x390   :  { %v1380_v38 = vpop.f32.mrf.mxu0 }
 0x391   :  { %v1381_v45 = vadd.f32 %v1380_v38, %v1205_v29  ;;  %v3807_v38 = vld [vmem:[#allocation15 + $0xac] sm:$0xf0] }
 0x396   :  { %v1408_v43 = vpop.f32.mrf.mxu2 }
 0x397   :  { %v1409_v47 = vadd.f32 %v1408_v43, %v1206_v33  ;;  %v3229_v43 = vld [vmem:[#allocation15 + $0xb0] sm:$0xf0] }
 0x398   :  { %v1392_v32 = vpop.f32.mrf.mxu1 }
 0x399   :  { %v1393_v36 = vadd.f32 %v1392_v32, %v1379_v34 }
 0x39b   :  { %v1425_v40 = vadd.f32 %v3956_v39, %v1393_v36  ;;  %v3355_v39 = vld [vmem:[#allocation15 + $0x1a0] sm:$0xf] }
 0x39e   :  { %v1420_v31 = vpop.f32.mrf.mxu3 }
 0x39f   :  { %v1421_v37 = vadd.f32 %v1420_v31, %v1407_v35 }
 0x3a0   :  { %v1394_v44 = vpop.f32.mrf.mxu1 }
 0x3a1   :  { %v1426_v42 = vadd.f32 %v3957_v41, %v1421_v37  ;;  %v1395_v49 = vadd.f32 %v1394_v44, %v1381_v45  ;;  %v3227_v37 = vld [vmem:[#allocation15 + $0xa0] sm:$0xf]  ;;  %v3839_v41 = vld [vmem:[#allocation15 + $0x1ac] sm:$0xf0] }
 0x3a2   :  { %v3356_v44 = vor.u32 %v3839_v41, %v3355_v39  ;;  %v3787_v39 = vld [vmem:[#allocation15 + $0xc] sm:$0xf0] }
 0x3a3   :  { %v1429_v46 = vadd.f32 %v1426_v42, %v1425_v40  ;;  %v1427_v53 = vadd.f32 %v3958_v52, %v1395_v49  ;;  %v3339_v52 = vld [vmem:[#allocation15 + $0x180] sm:$0xf] }
 0x3a4   :  { %1918 = vmatpush.bf16.msra.mxu1 %v3356_v44  ;;  %v3149_v44 = vld [vmem:[#allocation15 + $0x10] sm:$0xf0] }
 0x3a5   :  { %1430 = vadd.xlane.f32.xlu2 %v1429_v46  ;;  %v3837_v46 = vld [vmem:[#allocation15 + $0x1a4] sm:$0xf] }
 0x3a6   :  { %v1422_v50 = vpop.f32.mrf.mxu3 }
 0x3a7   :  { %v1423_v51 = vadd.f32 %v1422_v50, %v1409_v47  ;;  %v3357_v47 = vld [vmem:[#allocation15 + $0x1b0] sm:$0xf0]  ;;  %v3211_v50 = vld [vmem:[#allocation15 + $0x80] sm:$0xf] }
 0x3a8   :  { %v3360_v49 = vor.u32 %v3837_v46, %v3357_v47  ;;  %v3817_v47 = vld [vmem:[#allocation15 + $0x104] sm:$0xf] }
 0x3a9   :  { %v1428_v54 = vadd.f32 %v3959_v55, %v1423_v51  ;;  %v3803_v51 = vld [vmem:[#allocation15 + $0x8c] sm:$0xf0] }
 0x3aa   :  { %1946 = vmatpush.bf16.msra.mxu3 %v3360_v49  ;;  %v3835_v55 = vld [vmem:[#allocation15 + $0x18c] sm:$0xf0]  ;;  %v3277_v49 = vld [vmem:[#allocation15 + $0x110] sm:$0xf0] }
 0x3ab   :  { %v1432_v57 = vadd.f32 %v1428_v54, %v1427_v53  ;;  %v3340_v56 = vor.u32 %v3835_v55, %v3339_v52  ;;  %v3816_v52 = vld [vmem:[#allocation15 + $0xf4] sm:$0xf0] }
 0x3ac   :  { %v3848_v55 = vld [vmem:[#allocation15 + $0x1f4] sm:$0xf0] }
 0x3ad   :  { %1433 = vadd.xlane.f32.xlu0 %v1432_v57  ;;  %v3213_v57 = vld [vmem:[#allocation15 + $0x90] sm:$0xf0]  ;;  %1919 = vmatpush.bf16.msra.mxu1 %v3340_v56  ;;  %v3814_v56 = vld [vmem:[#allocation15 + $0xec] sm:$0xf] }
 0x3ae   :  { %1947 = vmatpush.bf16.msra.mxu3 %v3344_v48  ;;  %v3397_v48 = vld [vmem:[#allocation15 + $0x1f8] sm:$0xf0] }
 0x3af   :  { %v3400_v63 = vor.u32 %v3846_v59, %v3397_v48  ;;  %v3315_v59 = vld [vmem:[#allocation15 + $0x148] sm:$0xf]  ;;  %v3794_v48 = vld [vmem:[#allocation15 + $0x4c] sm:$0xf] }
 0x3b1   :  { %1920 = vmatpush.bf16.msra.mxu1 %v3324_v4  ;;  %v3380_v4 = vor.u32 %v3844_v2, %v3379_v1 }
 0x3b2   :  { %1948 = vmatpush.bf16.msra.mxu3 %v3328_v8 }
 0x3b5   :  { %1921 = vmatpush.bf16.msra.mxu1 %v3308_v16  ;;  %v3237_v16 = vld [vmem:[#allocation15 + $0xb8] sm:$0xf0] }
 0x3b6   :  { %1949 = vmatpush.bf16.msra.mxu3 %v3312_v20  ;;  %v3240_v19 = vor.u32 %v3806_v15, %v3237_v16  ;;  %v3838_v20 = vld [vmem:[#allocation15 + $0x1ac] sm:$0xf]  ;;  %v3301_v15 = vld [vmem:[#allocation15 + $0x138] sm:$0xf0] }
 0x418   :  { %v1431_v23 = vpop.xlane.xlu2 %1430 }
 0x419   :  { %v1442_v24 = vmul.f32 %v4384_v22, %v1431_v23  ;;  %v3791_v23 = vld [vmem:[#allocation15 + $0x2c] sm:$0xf0] }
 0x41b   :  { %v4387_v25 = vsub.f32 %v1425_v40, %v1442_v24  ;;  %v4389_v26 = vsub.f32 %v1426_v42, %v1442_v24  ;;  %v3228_v40 = vor.u32 %v3807_v38, %v3227_v37  ;;  %v3805_v42 = vld [vmem:[#allocation15 + $0xa4] sm:$0xf]  ;;  %v3291_v24 = vld [vmem:[#allocation15 + $0x120] sm:$0xf] }
 0x41c   :  { %v3232_v45 = vor.u32 %v3805_v42, %v3229_v43  ;;  %v3147_v38 = vld [vmem:[#allocation15] sm:$0xf]  ;;  %v3819_v42 = vld [vmem:[#allocation15 + $0x10c] sm:$0xf0]  ;;  %v3785_v43 = vld [vmem:[#allocation15 + $0x4] sm:$0xf] }
 0x41d   :  { %v1448_v27 = vmul.f32 %v4387_v25, %v4387_v25  ;;  %v1449_v28 = vmul.f32 %v4389_v26, %v4389_v26  ;;  %1904 = vmatpush.bf16.msra.mxu0 %v3228_v40  ;;  %v3275_v40 = vld [vmem:[#allocation15 + $0x100] sm:$0xf]  ;;  %v3148_v41 = vor.u32 %v3787_v39, %v3147_v38  ;;  %v3152_v46 = vor.u32 %v3785_v43, %v3149_v44  ;;  %v3349_v39 = vld [vmem:[#allocation15 + $0x198] sm:$0xf0]  ;;  %v3800_v43 = vld [vmem:[#allocation15 + $0x74] sm:$0xf0] }
 0x41e   :  { %1932 = vmatpush.bf16.msra.mxu2 %v3232_v45  ;;  %v3276_v45 = vor.u32 %v3819_v42, %v3275_v40  ;;  %v3203_v42 = vld [vmem:[#allocation15 + $0x68] sm:$0xf] }
 0x41f   :  { %v1452_v29 = vadd.f32 %v1449_v28, %v1448_v27  ;;  %v3164_v27 = vor.u32 %v3791_v23, %v3163_v21  ;;  %v3823_v28 = vld [vmem:[#allocation15 + $0x12c] sm:$0xf0]  ;;  %v3365_v21 = vld [vmem:[#allocation15 + $0x1b8] sm:$0xf0]  ;;  %v3219_v23 = vld [vmem:[#allocation15 + $0x88] sm:$0xf] }
 0x420   :  { %v1434_v30 = vpop.xlane.xlu0 %1433  ;;  %v3331_v44 = vld [vmem:[#allocation15 + $0x168] sm:$0xf] }
 0x421   :  { %v1443_v32 = vmul.f32 %v4384_v22, %v1434_v30  ;;  %1453 = vadd.xlane.f32.xlu1 %v1452_v29  ;;  %v3789_v29 = vld [vmem:[#allocation15 + $0x24] sm:$0xf]  ;;  %v3165_v30 = vld [vmem:[#allocation15 + $0x30] sm:$0xf0] }
 0x423   :  { %v4396_v33 = vsub.f32 %v1427_v53, %v1443_v32  ;;  %v4398_v34 = vsub.f32 %v1428_v54, %v1443_v32  ;;  %v3212_v53 = vor.u32 %v3803_v51, %v3211_v50  ;;  %v3801_v54 = vld [vmem:[#allocation15 + $0x84] sm:$0xf]  ;;  %v3292_v32 = vor.u32 %v3823_v28, %v3291_v24  ;;  %v3267_v50 = vld [vmem:[#allocation15 + $0xe8] sm:$0xf]  ;;  %v3804_v28 = vld [vmem:[#allocation15 + $0x94] sm:$0xf0] }
 0x424   :  { %v3216_v58 = vor.u32 %v3801_v54, %v3213_v57  ;;  %v3280_v51 = vor.u32 %v3817_v47, %v3277_v49  ;;  %v3268_v54 = vor.u32 %v3816_v52, %v3267_v50  ;;  %v3798_v47 = vld [vmem:[#allocation15 + $0x6c] sm:$0xf]  ;;  %v3205_v49 = vld [vmem:[#allocation15 + $0x78] sm:$0xf0] }
 0x425   :  { %v1450_v35 = vmul.f32 %v4396_v33, %v4396_v33  ;;  %v1451_v36 = vmul.f32 %v4398_v34, %v4398_v34  ;;  %1905 = vmatpush.bf16.msra.mxu0 %v3212_v53  ;;  %1922 = vmatpush.bf16.msra.mxu1 %v3292_v32  ;;  %v3395_v53 = vld [vmem:[#allocation15 + $0x1e8] sm:$0xf]  ;;  %v3802_v32 = vld [vmem:[#allocation15 + $0x8c] sm:$0xf]  ;;  %v3208_v52 = vor.u32 %v3798_v47, %v3205_v49 }
 0x426   :  { %1933 = vmatpush.bf16.msra.mxu2 %v3216_v58  ;;  %v3396_v57 = vor.u32 %v3848_v55, %v3395_v53  ;;  %v3269_v58 = vld [vmem:[#allocation15 + $0xf8] sm:$0xf0]  ;;  %v3830_v53 = vld [vmem:[#allocation15 + $0x16c] sm:$0xf] }
 0x427   :  { %v1455_v31 = vadd.f32 %v1451_v36, %v1450_v35  ;;  %v3168_v35 = vor.u32 %v3789_v29, %v3165_v30  ;;  %v3821_v36 = vld [vmem:[#allocation15 + $0x124] sm:$0xf]  ;;  %v3272_v60 = vor.u32 %v3814_v56, %v3269_v58  ;;  %v3347_v29 = vld [vmem:[#allocation15 + $0x188] sm:$0xf]  ;;  %v3836_v30 = vld [vmem:[#allocation15 + $0x194] sm:$0xf0] }
 0x428   :  { %v3348_v38 = vor.u32 %v3836_v30, %v3347_v29  ;;  %v3333_v55 = vld [vmem:[#allocation15 + $0x178] sm:$0xf0]  ;;  %v3796_v58 = vld [vmem:[#allocation15 + $0x54] sm:$0xf0] }
 0x429   :  { %1456 = vadd.xlane.f32.xlu2 %v1455_v31  ;;  %1906 = vmatpush.bf16.msra.mxu0 %v3196_v0  ;;  %v3293_v31 = vld [vmem:[#allocation15 + $0x130] sm:$0xf0]  ;;  %v3252_v0 = vor.u32 %v3812_v62, %v3251_v61  ;;  %v3336_v56 = vor.u32 %v3830_v53, %v3333_v55  ;;  %v3189_v61 = vld [vmem:[#allocation15 + $0x58] sm:$0xf0]  ;;  %v3826_v62 = vld [vmem:[#allocation15 + $0x14c] sm:$0xf] }
 0x42a   :  { %1934 = vmatpush.bf16.msra.mxu2 %v3200_v5  ;;  %v3296_v37 = vor.u32 %v3821_v36, %v3293_v31  ;;  %1923 = vmatpush.bf16.msra.mxu1 %v3276_v45  ;;  %v3253_v5 = vld [vmem:[#allocation15 + $0xd8] sm:$0xf0]  ;;  %v3834_v36 = vld [vmem:[#allocation15 + $0x18c] sm:$0xf]  ;;  %v3204_v45 = vor.u32 %v3800_v43, %v3203_v42  ;;  %v3192_v6 = vor.u32 %v3794_v48, %v3189_v61  ;;  %v3459_v61 = vld [vmem:[#allocation17 + $0x70] sm:$0xf] }
 0x42b   :  { %v3256_v8 = vor.u32 %v3810_v3, %v3253_v5  ;;  %v3317_v3 = vld [vmem:[#allocation15 + $0x158] sm:$0xf0] }
 0x42c   :  { %1950 = vmatpush.bf16.msra.mxu3 %v3296_v37  ;;  %v3220_v37 = vor.u32 %v3804_v28, %v3219_v23  ;;  %v3320_v10 = vor.u32 %v3826_v62, %v3317_v3  ;;  %v3283_v23 = vld [vmem:[#allocation15 + $0x108] sm:$0xf]  ;;  %v3786_v28 = vld [vmem:[#allocation15 + $0xc] sm:$0xf]  ;;  %v3157_v29 = vld [vmem:[#allocation15 + $0x18] sm:$0xf0] }
 0x42d   :  { %1907 = vmatpush.bf16.msra.mxu0 %v3180_v12  ;;  %v3363_v12 = vld [vmem:[#allocation15 + $0x1a8] sm:$0xf]  ;;  %v3523_v62 = vld [vmem:[#allocation17 + $0xf0] sm:$0xf] }
 0x42e   :  { %1935 = vmatpush.bf16.msra.mxu2 %v3184_v17  ;;  %1972 = vmatpush.bf16.msrb.mxu1 %v3396_v57  ;;  %v3364_v18 = vor.u32 %v3840_v14, %v3363_v12  ;;  %v3173_v12 = vld [vmem:[#allocation15 + $0x38] sm:$0xf0]  ;;  %v3822_v14 = vld [vmem:[#allocation15 + $0x12c] sm:$0xf] }
 0x430   :  { %1951 = vmatpush.bf16.msra.mxu3 %v3280_v51 }
 0x431   :  { %1908 = vmatpush.bf16.msra.mxu0 %v3164_v27  ;;  %v3368_v27 = vor.u32 %v3838_v20, %v3365_v21  ;;  %v3176_v21 = vor.u32 %v3790_v11, %v3173_v12  ;;  %v3515_v12 = vld [vmem:[#allocation17 + $0xe0] sm:$0xf] }
 0x432   :  { %1936 = vmatpush.bf16.msra.mxu2 %v3168_v35  ;;  %1973 = vmatpush.bf16.msrb.mxu1 %v3380_v4  ;;  %v3221_v35 = vld [vmem:[#allocation15 + $0x98] sm:$0xf0]  ;;  %v3171_v4 = vld [vmem:[#allocation15 + $0x28] sm:$0xf] }
 0x433   :  { %v3224_v40 = vor.u32 %v3802_v32, %v3221_v35  ;;  %v3172_v16 = vor.u32 %v3792_v7, %v3171_v4  ;;  %v3818_v32 = vld [vmem:[#allocation15 + $0x10c] sm:$0xf]  ;;  %v3285_v35 = vld [vmem:[#allocation15 + $0x118] sm:$0xf0] }
 0x434   :  { %2000 = vmatpush.bf16.msrb.mxu3 %v3400_v63  ;;  %v3288_v42 = vor.u32 %v3818_v32, %v3285_v35  ;;  %v3571_v32 = vld [vmem:[#allocation17 + $0x150] sm:$0xf]  ;;  %v3892_v35 = vld [vmem:[#allocation17 + $0x154] sm:$0xf0] }
 0x435   :  { %1909 = vmatpush.bf16.msra.mxu0 %v3148_v41  ;;  %v3352_v41 = vor.u32 %v3834_v36, %v3349_v39 }
 0x436   :  { %1937 = vmatpush.bf16.msra.mxu2 %v3152_v46  ;;  %1974 = vmatpush.bf16.msrb.mxu1 %v3364_v18  ;;  %v3832_v46 = vld [vmem:[#allocation15 + $0x174] sm:$0xf0]  ;;  %v3155_v18 = vld [vmem:[#allocation15 + $0x8] sm:$0xf] }
 0x437   :  { %v3332_v51 = vor.u32 %v3832_v46, %v3331_v44  ;;  %v1486_v46 = vld [vmem:[#allocation12] sm:$0x3] }
 0x438   :  { %2001 = vmatpush.bf16.msrb.mxu3 %v3384_v9  ;;  %v3824_v9 = vld [vmem:[#allocation15 + $0x134] sm:$0xf0]  ;;  %v1489_v53 = vperm.slane %v1486_v46, 1 }
 0x439   :  { %1958 = vmatpush.bf16.msrb.mxu0 %v3268_v54  ;;  %v3187_v54 = vld [vmem:[#allocation15 + $0x48] sm:$0xf] }
 0x43a   :  { %1986 = vmatpush.bf16.msrb.mxu2 %v3272_v60  ;;  %1975 = vmatpush.bf16.msrb.mxu1 %v3348_v38  ;;  %v3828_v60 = vld [vmem:[#allocation15 + $0x154] sm:$0xf0]  ;;  %v3188_v1 = vor.u32 %v3796_v58, %v3187_v54 }
 0x43b   :  { %v3316_v2 = vor.u32 %v3828_v60, %v3315_v59 }
 0x43c   :  { %2002 = vmatpush.bf16.msrb.mxu3 %v3368_v27  ;;  %v3304_v27 = vor.u32 %v3822_v14, %v3301_v15  ;;  %v3579_v15 = vld [vmem:[#allocation17 + $0x160] sm:$0xf] }
 0x43d   :  { %1959 = vmatpush.bf16.msrb.mxu0 %v3252_v0 }
 0x43e   :  { %1987 = vmatpush.bf16.msrb.mxu2 %v3256_v8  ;;  %1976 = vmatpush.bf16.msrb.mxu1 %v3332_v51  ;;  %v3299_v8 = vld [vmem:[#allocation15 + $0x128] sm:$0xf]  ;;  %v1488_v51 = vperm.slane %v1486_v46, 0  ;;  %v3856_v46 = vld [vmem:[#allocation17 + $0x34] sm:$0xf0] }
 0x440   :  { %2003 = vmatpush.bf16.msrb.mxu3 %v3352_v41  ;;  %v3160_v41 = vor.u32 %v3786_v28, %v3157_v29  ;;  %v3876_v28 = vld [vmem:[#allocation17 + $0xd4] sm:$0xf0] }
 0x441   :  { %1960 = vmatpush.bf16.msrb.mxu0 %v3236_v13 }
 0x442   :  { %1988 = vmatpush.bf16.msrb.mxu2 %v3240_v19  ;;  %1977 = vmatpush.bf16.msrb.mxu1 %v3316_v2  ;;  %v3788_v19 = vld [vmem:[#allocation15 + $0x14] sm:$0xf0] }
 0x444   :  { %2004 = vmatpush.bf16.msrb.mxu3 %v3336_v56 }
 0x445   :  { %1961 = vmatpush.bf16.msrb.mxu0 %v3220_v37  ;;  %v3156_v37 = vor.u32 %v3788_v19, %v3155_v18  ;;  %v3643_v18 = vld [vmem:[#allocation17 + $0x1e0] sm:$0xf]  ;;  %v3910_v19 = vld [vmem:[#allocation17 + $0x1e4] sm:$0xf0] }
 0x446   :  { %1989 = vmatpush.bf16.msrb.mxu2 %v3224_v40 }
 0x448   :  { %2005 = vmatpush.bf16.msrb.mxu3 %v3320_v10  ;;  %v3862_v10 = vld [vmem:[#allocation17 + $0x64] sm:$0xf0] }
 0x449   :  { %1962 = vmatpush.bf16.msrb.mxu0 %v3204_v45 }
 0x44a   :  { %1990 = vmatpush.bf16.msrb.mxu2 %v3208_v52  ;;  %v1496_v52 = vld [vmem:[#allocation14] sm:$0x3] }
 0x44b   :  { %v1498_v54 = vperm.slane %v1496_v52, 0 }
 0x44c   :  { %2006 = vmatpush.bf16.msrb.mxu3 %v3304_v27  ;;  %v3507_v27 = vld [vmem:[#allocation17 + $0xd0] sm:$0xf] }
 0x44d   :  { %1963 = vmatpush.bf16.msrb.mxu0 %v3188_v1  ;;  %v3587_v1 = vld [vmem:[#allocation17 + $0x170] sm:$0xf] }
 0x44e   :  { %1991 = vmatpush.bf16.msrb.mxu2 %v3192_v6 }
 0x450   :  { %2007 = vmatpush.bf16.msrb.mxu3 %v3288_v42  ;;  %v3572_v42 = vor.u32 %v3892_v35, %v3571_v32  ;;  %v3859_v32 = vld [vmem:[#allocation17 + $0x54] sm:$0xf]  ;;  %v3445_v35 = vld [vmem:[#allocation17 + $0x58] sm:$0xf0] }
 0x451   :  { %1964 = vmatpush.bf16.msrb.mxu0 %v3172_v16 }
 0x452   :  { %1992 = vmatpush.bf16.msrb.mxu2 %v3176_v21  ;;  %v3443_v21 = vld [vmem:[#allocation17 + $0x50] sm:$0xf] }
 0x455   :  { %1965 = vmatpush.bf16.msrb.mxu0 %v3156_v37  ;;  %v3435_v37 = vld [vmem:[#allocation17 + $0x40] sm:$0xf] }
 0x456   :  { %1993 = vmatpush.bf16.msrb.mxu2 %v3160_v41  ;;  %v3874_v41 = vld [vmem:[#allocation17 + $0xc4] sm:$0xf0] }
 0x494   :  { %v1454_v17 = vpop.xlane.xlu1 %1453 }
 0x495   :  { %v1458_v24 = vmul.f32 %v1454_v17, %v4384_v22  ;;  %v3300_v17 = vor.u32 %v3824_v9, %v3299_v8  ;;  %v3451_v9 = vld [vmem:[#allocation17 + $0x60] sm:$0xf] }
 0x497   :  { %v4405_v31 = vadd.f32 1e-05, %v1458_v24  ;;  %v3820_v24 = vld [vmem:[#allocation15 + $0x114] sm:$0xf0]  ;;  %1978 = vmatpush.bf16.msrb.mxu1 %v3300_v17  ;;  %v3894_v17 = vld [vmem:[#allocation17 + $0x164] sm:$0xf0] }
 0x498   :  { %v3284_v38 = vor.u32 %v3820_v24, %v3283_v23  ;;  %v3860_v24 = vld [vmem:[#allocation17 + $0x54] sm:$0xf0]  ;;  %v3580_v29 = vor.u32 %v3894_v17, %v3579_v15  ;;  %v3866_v17 = vld [vmem:[#allocation17 + $0x84] sm:$0xf0] }
 0x499   :  { %3948 = vrsqrt.f32 %v4405_v31  ;;  %vm1468_vm4 = vweird.f32 %v4405_v31 }
 0x49b   :  { %1979 = vmatpush.bf16.msrb.mxu1 %v3284_v38  ;;  %v3508_v38 = vor.u32 %v3876_v28, %v3507_v27  ;;  %v3547_v27 = vld [vmem:[#allocation17 + $0x120] sm:$0xf]  ;;  %v3886_v28 = vld [vmem:[#allocation17 + $0x124] sm:$0xf0] }
 0x49c   :  { %v1457_v50 = vpop.xlane.xlu2 %1456 }
 0x49d   :  { %v1459_v57 = vmul.f32 %v1457_v50, %v4384_v22 }
 0x49f   :  { %v3949_v63 = vpop.eup %3948  ;;  %v4409_v0 = vadd.f32 1e-05, %v1459_v57  ;;  %v1499_v57 = vperm.slane %v1496_v52, 1 }
 0x4a0   :  { %v1463_v5 = vmul.f32 %v3949_v63, %v4405_v31  ;;  %vm1469_vm3 = vweird.f32 %v3949_v63 }
 0x4a1   :  { %3950 = vrsqrt.f32 %v4409_v0  ;;  %vm1470_vm5 = vmor %vm1468_vm4, %vm1469_vm3  ;;  %vm1478_vm7 = vweird.f32 %v4409_v0 }
 0x4a2   :  { %v1464_v13 = vmul.f32 %v3949_v63, %v1463_v5  ;;  %v3651_v5 = vld [vmem:[#allocation17 + $0x1f0] sm:$0xf] }
 0x4a4   :  { %v1465_v20 = vmul.f32 0.5, %v1464_v13  ;;  %v3878_v13 = vld [vmem:[#allocation17 + $0xe4] sm:$0xf0] }
 0x4a5   :  { %v3516_v23 = vor.u32 %v3878_v13, %v3515_v12  ;;  %v3861_v13 = vld [vmem:[#allocation17 + $0x64] sm:$0xf] }
 0x4a6   :  { %v1466_v30 = vsub.f32 1.5, %v1465_v20  ;;  %v3452_v20 = vor.u32 %v3862_v10, %v3451_v9  ;;  %v3555_v10 = vld [vmem:[#allocation17 + $0x130] sm:$0xf] }
 0x4a7   :  { %v3951_v36 = vpop.eup %3950 }
 0x4a8   :  { %v1467_v39 = vmul.f32 %v3949_v63, %v1466_v30  ;;  %v1473_v40 = vmul.f32 %v3951_v36, %v4409_v0  ;;  %vm1479_vm6 = vweird.f32 %v3951_v36  ;;  %v3644_v30 = vor.u32 %v3910_v19, %v3643_v18  ;;  %v3627_v19 = vld [vmem:[#allocation17 + $0x1c0] sm:$0xf] }
 0x4a9   :  { %vm1480_vm8 = vmor %vm1478_vm7, %vm1479_vm6 }
 0x4aa   :  { %v1474_v43 = vmul.f32 %v3951_v36, %v1473_v40  ;;  %v1471_v44 = vsel %vm1470_vm5, %v3949_v63, %v1467_v39  ;;  %v3880_v63 = vld [vmem:[#allocation17 + $0xf4] sm:$0xf0]  ;;  %v3858_v39 = vld [vmem:[#allocation17 + $0x44] sm:$0xf0]  ;;  %v3499_v40 = vld [vmem:[#allocation17 + $0xc0] sm:$0xf] }
 0x4ab   :  { %v1482_v49 = vmul.f32 %v1471_v44, %v4387_v25  ;;  %v1483_v50 = vmul.f32 %v1471_v44, %v4389_v26  ;;  %v3864_v26 = vld [vmem:[#allocation17 + $0x74] sm:$0xf0]  ;;  %v3524_v11 = vor.u32 %v3880_v63, %v3523_v62  ;;  %v3427_v44 = vld [vmem:[#allocation17 + $0x30] sm:$0xf]  ;;  %v3863_v62 = vld [vmem:[#allocation17 + $0x74] sm:$0xf] }
 0x4ac   :  { %v1475_v45 = vmul.f32 0.5, %v1474_v43  ;;  %v3460_v8 = vor.u32 %v3864_v26, %v3459_v61  ;;  %v3436_v43 = vor.u32 %v3858_v39, %v3435_v37  ;;  %v3890_v26 = vld [vmem:[#allocation17 + $0x144] sm:$0xf0]  ;;  %v3461_v63 = vld [vmem:[#allocation17 + $0x78] sm:$0xf0] }
 0x4ad   :  { %v1492_v59 = vmul.f32 %v1488_v51, %v1482_v49  ;;  %v1493_v60 = vmul.f32 %v1489_v53, %v1483_v50  ;;  %v3872_v49 = vld [vmem:[#allocation17 + $0xb4] sm:$0xf0]  ;;  %v3428_v50 = vor.u32 %v3856_v46, %v3427_v44  ;;  %v3619_v37 = vld [vmem:[#allocation17 + $0x1b0] sm:$0xf]  ;;  %v3857_v46 = vld [vmem:[#allocation17 + $0x44] sm:$0xf] }
 0x4ae   :  { %v1476_v47 = vsub.f32 1.5, %v1475_v45  ;;  %v3500_v45 = vor.u32 %v3874_v41, %v3499_v40  ;;  %v3877_v40 = vld [vmem:[#allocation17 + $0xe4] sm:$0xf]  ;;  %v3517_v41 = vld [vmem:[#allocation17 + $0xe8] sm:$0xf0] }
 0x4af   :  { %v4420_v2 = vadd.f32 %v1498_v54, %v1492_v59  ;;  %v4424_v3 = vadd.f32 %v1499_v57, %v1493_v60  ;;  %v3403_v60 = vld [vmem:[#allocation17] sm:$0xf]  ;;  %v3884_v44 = vld [vmem:[#allocation17 + $0x114] sm:$0xf0] }
 0x4b0   :  { %v1477_v55 = vmul.f32 %v3951_v36, %v1476_v47  ;;  %v3491_v47 = vld [vmem:[#allocation17 + $0xb0] sm:$0xf] }
 0x4b1   :  { %v3492_v52 = vor.u32 %v3872_v49, %v3491_v47  ;;  %v3437_v47 = vld [vmem:[#allocation17 + $0x48] sm:$0xf0] }
 0x4b2   :  { %v1481_v31 = vsel %vm1480_vm8, %v3951_v36, %v1477_v55  ;;  %v3444_v36 = vor.u32 %v3860_v24, %v3443_v21  ;;  %v3483_v55 = vld [vmem:[#allocation17 + $0xa0] sm:$0xf]  ;;  %v3879_v21 = vld [vmem:[#allocation17 + $0xf4] sm:$0xf]  ;;  %v3525_v24 = vld [vmem:[#allocation17 + $0xf8] sm:$0xf0]  ;;  %v3440_v49 = vor.u32 %v3857_v46, %v3437_v47 }
 0x4b3   :  { %v1484_v56 = vmul.f32 %v1481_v31, %v4396_v33  ;;  %v1485_v58 = vmul.f32 %v1481_v31, %v4398_v34  ;;  %v3896_v33 = vld [vmem:[#allocation17 + $0x174] sm:$0xf0]  ;;  %v3870_v31 = vld [vmem:[#allocation17 + $0xa4] sm:$0xf0]  ;;  %v3477_v46 = vld [vmem:[#allocation17 + $0x98] sm:$0xf0] }
 0x4b4   :  { %v3912_v34 = vld [vmem:[#allocation17 + $0x1f4] sm:$0xf0]  ;;  %v3588_v14 = vor.u32 %v3896_v33, %v3587_v1  ;;  %v3464_v33 = vor.u32 %v3863_v62, %v3461_v63  ;;  %v3873_v63 = vld [vmem:[#allocation17 + $0xc4] sm:$0xf]  ;;  %v3907_v47 = vld [vmem:[#allocation17 + $0x1d4] sm:$0xf] }
 0x4b5   :  { %v1494_v48 = vmul.f32 %v1488_v51, %v1484_v56  ;;  %v1495_v25 = vmul.f32 %v1489_v53, %v1485_v58  ;;  %v3652_v16 = vor.u32 %v3912_v34, %v3651_v5  ;;  %v3419_v51 = vld [vmem:[#allocation17 + $0x20] sm:$0xf]  ;;  %v3854_v53 = vld [vmem:[#allocation17 + $0x24] sm:$0xf0]  ;;  %v3411_v56 = vld [vmem:[#allocation17 + $0x10] sm:$0xf] }
 0x4b6   :  { %v3852_v58 = vld [vmem:[#allocation17 + $0x14] sm:$0xf0]  ;;  %v3475_v5 = vld [vmem:[#allocation17 + $0x90] sm:$0xf] }
 0x4b7   :  { %v4422_v0 = vadd.f32 %v1498_v54, %v1494_v48  ;;  %v4426_v4 = vadd.f32 %v1499_v57, %v1495_v25  ;;  %v3420_v54 = vor.u32 %v3854_v53, %v3419_v51  ;;  %v3484_v57 = vor.u32 %v3870_v31, %v3483_v55  ;;  %v3850_v48 = vld [vmem:[#allocation17 + $0x4] sm:$0xf0]  ;;  %v3563_v25 = vld [vmem:[#allocation17 + $0x140] sm:$0xf]  ;;  %v3868_v34 = vld [vmem:[#allocation17 + $0x94] sm:$0xf0] }
 0x4b8   :  { %v3412_v59 = vor.u32 %v3852_v58, %v3411_v56  ;;  %v3404_v61 = vor.u32 %v3850_v48, %v3403_v60  ;;  %v3564_v1 = vor.u32 %v3890_v26, %v3563_v25  ;;  %v3902_v51 = vld [vmem:[#allocation17 + $0x1a4] sm:$0xf0]  ;;  %v3875_v53 = vld [vmem:[#allocation17 + $0xd4] sm:$0xf]  ;;  %v3509_v55 = vld [vmem:[#allocation17 + $0xd8] sm:$0xf0] }
 0x4b9   :  { %v1506_v6 = vpack.c.bf16 %v4422_v0, %v4420_v2  ;;  %v1507_v7 = vpack.c.bf16 %v4426_v4, %v4424_v3  ;;  %v3512_v31 = vor.u32 %v3875_v53, %v3509_v55  ;;  %v3855_v58 = vld [vmem:[#allocation17 + $0x34] sm:$0xf]  ;;  %v3589_v25 = vld [vmem:[#allocation17 + $0x178] sm:$0xf0]  ;;  %v3900_v62 = vld [vmem:[#allocation17 + $0x194] sm:$0xf0] }
 0x4ba   :  { %v3895_v48 = vld [vmem:[#allocation17 + $0x174] sm:$0xf] }
 0x4bb   :  { %1910 = vmatmul.bf16.vlgmr.msra.gmra.mxu0 %v1506_v6  ;;  %1924 = vmatmul.bf16.vlgmr.msra.gmra.mxu1 %v1507_v7  ;;  %v3592_v26 = vor.u32 %v3895_v48, %v3589_v25  ;;  %v3887_v55 = vld [vmem:[#allocation17 + $0x134] sm:$0xf]  ;;  %v3629_v48 = vld [vmem:[#allocation17 + $0x1c8] sm:$0xf0] }
 0x4bc   :  { %1938 = vmatmul.bf16.vlgmr.msra.gmra.mxu2 %v1506_v6  ;;  %1952 = vmatmul.bf16.vlgmr.msra.gmra.mxu3 %v1507_v7 }
 0x4bd   :  { %2416 = vmatpush.bf16.msra.mxu0 %v3460_v8  ;;  %2430 = vmatpush.bf16.msra.mxu1 %v3524_v11  ;;  %v3908_v8 = vld [vmem:[#allocation17 + $0x1d4] sm:$0xf0] }
 0x4be   :  { %2444 = vmatpush.bf16.msra.mxu2 %v3588_v14  ;;  %2458 = vmatpush.bf16.msra.mxu3 %v3652_v16  ;;  %v3888_v11 = vld [vmem:[#allocation17 + $0x134] sm:$0xf0]  ;;  %v3453_v14 = vld [vmem:[#allocation17 + $0x68] sm:$0xf0]  ;;  %v3467_v16 = vld [vmem:[#allocation17 + $0x80] sm:$0xf] }
 0x4bf   :  { %v3556_v12 = vor.u32 %v3888_v11, %v3555_v10  ;;  %v3456_v15 = vor.u32 %v3861_v13, %v3453_v14  ;;  %v3468_v18 = vor.u32 %v3866_v17, %v3467_v16  ;;  %v3595_v10 = vld [vmem:[#allocation17 + $0x180] sm:$0xf]  ;;  %v3898_v11 = vld [vmem:[#allocation17 + $0x184] sm:$0xf0]  ;;  %v3871_v14 = vld [vmem:[#allocation17 + $0xb4] sm:$0xf] }
 0x4c0   :  { %v3596_v13 = vor.u32 %v3898_v11, %v3595_v10  ;;  %v3911_v17 = vld [vmem:[#allocation17 + $0x1f4] sm:$0xf]  ;;  %v3541_v11 = vld [vmem:[#allocation17 + $0x118] sm:$0xf0] }
 0x4c1   :  { %2417 = vmatpush.bf16.msra.mxu0 %v3452_v20  ;;  %2431 = vmatpush.bf16.msra.mxu1 %v3516_v23  ;;  %v3906_v20 = vld [vmem:[#allocation17 + $0x1c4] sm:$0xf0]  ;;  %v3883_v10 = vld [vmem:[#allocation17 + $0x114] sm:$0xf] }
 0x4c2   :  { %2445 = vmatpush.bf16.msra.mxu2 %v3580_v29  ;;  %2459 = vmatpush.bf16.msra.mxu3 %v3644_v30  ;;  %v3628_v23 = vor.u32 %v3906_v20, %v3627_v19  ;;  %v3528_v29 = vor.u32 %v3879_v21, %v3525_v24  ;;  %v3548_v30 = vor.u32 %v3886_v28, %v3547_v27  ;;  %v3851_v20 = vld [vmem:[#allocation17 + $0x14] sm:$0xf]  ;;  %v3413_v21 = vld [vmem:[#allocation17 + $0x18] sm:$0xf0] }
 0x4c3   :  { %v3416_v24 = vor.u32 %v3851_v20, %v3413_v21  ;;  %v3573_v27 = vld [vmem:[#allocation17 + $0x158] sm:$0xf0]  ;;  %v3899_v21 = vld [vmem:[#allocation17 + $0x194] sm:$0xf] }
 0x4c5   :  { %2418 = vmatpush.bf16.msra.mxu0 %v3444_v36  ;;  %2432 = vmatpush.bf16.msra.mxu1 %v3508_v38  ;;  %v3448_v36 = vor.u32 %v3859_v32, %v3445_v35  ;;  %v3904_v38 = vld [vmem:[#allocation17 + $0x1b4] sm:$0xf0]  ;;  %v3909_v32 = vld [vmem:[#allocation17 + $0x1e4] sm:$0xf] }
 0x4c6   :  { %2446 = vmatpush.bf16.msra.mxu2 %v3572_v42  ;;  %v3620_v39 = vor.u32 %v3904_v38, %v3619_v37  ;;  %v3520_v42 = vor.u32 %v3877_v40, %v3517_v41  ;;  %v3849_v38 = vld [vmem:[#allocation17 + $0x4] sm:$0xf]  ;;  %v4435_v41 = vld [vmem:[%s4473_s9] sm:$0xf] }
 0x4c7   :  { %v3889_v40 = vld [vmem:[#allocation17 + $0x144] sm:$0xf] }
 0x4c9   :  { %2419 = vmatpush.bf16.msra.mxu0 %v3436_v43  ;;  %2433 = vmatpush.bf16.msra.mxu1 %v3500_v45  ;;  %v3539_v43 = vld [vmem:[#allocation17 + $0x110] sm:$0xf] }
 0x4ca   :  { %2447 = vmatpush.bf16.msra.mxu2 %v3564_v1  ;;  %v3540_v45 = vor.u32 %v3884_v44, %v3539_v43  ;;  %v3501_v1 = vld [vmem:[#allocation17 + $0xc8] sm:$0xf0] }
 0x4cb   :  { %1966 = vmatmul.bf16.vlgmr.msrb.gmra.mxu0 %v1506_v6  ;;  %1980 = vmatmul.bf16.vlgmr.msrb.gmra.mxu1 %v1507_v7  ;;  %v3565_v43 = vld [vmem:[#allocation17 + $0x148] sm:$0xf0] }
 0x4cc   :  { %1994 = vmatmul.bf16.vlgmr.msrb.gmra.mxu2 %v1506_v6  ;;  %2008 = vmatmul.bf16.vlgmr.msrb.gmra.mxu3 %v1507_v7  ;;  %v3635_v6 = vld [vmem:[#allocation17 + $0x1d0] sm:$0xf]  ;;  %v3476_v7 = vor.u32 %v3868_v34, %v3475_v5  ;;  %v3504_v5 = vor.u32 %v3873_v63, %v3501_v1  ;;  %v3853_v34 = vld [vmem:[#allocation17 + $0x24] sm:$0xf]  ;;  %v3568_v44 = vor.u32 %v3889_v40, %v3565_v43  ;;  %v3903_v1 = vld [vmem:[#allocation17 + $0x1b4] sm:$0xf] }
 0x4cd   :  { %2420 = vmatpush.bf16.msra.mxu0 %v3428_v50  ;;  %2434 = vmatpush.bf16.msra.mxu1 %v3492_v52  ;;  %v3636_v9 = vor.u32 %v3908_v8, %v3635_v6  ;;  %v3611_v50 = vld [vmem:[#allocation17 + $0x1a0] sm:$0xf]  ;;  %v3421_v6 = vld [vmem:[#allocation17 + $0x28] sm:$0xf0]  ;;  %v3897_v43 = vld [vmem:[#allocation17 + $0x184] sm:$0xf] }
 0x4ce   :  { %2448 = vmatpush.bf16.msra.mxu2 %v3556_v12  ;;  %v3612_v52 = vor.u32 %v3902_v51, %v3611_v50  ;;  %v3424_v8 = vor.u32 %v3853_v34, %v3421_v6  ;;  %v3637_v50 = vld [vmem:[#allocation17 + $0x1d8] sm:$0xf0] }
 0x4cf   :  { %2460 = vmatpush.bf16.msra.mxu3 %v3636_v9  ;;  %v3581_v9 = vld [vmem:[#allocation17 + $0x168] sm:$0xf0]  ;;  %v3640_v53 = vor.u32 %v3907_v47, %v3637_v50 }
 0x4d1   :  { %2421 = vmatpush.bf16.msra.mxu0 %v3420_v54  ;;  %2435 = vmatpush.bf16.msra.mxu1 %v3484_v57  ;;  %v3531_v54 = vld [vmem:[#allocation17 + $0x100] sm:$0xf]  ;;  %v3882_v57 = vld [vmem:[#allocation17 + $0x104] sm:$0xf0] }
 0x4d2   :  { %2449 = vmatpush.bf16.msra.mxu2 %v3548_v30  ;;  %v3532_v56 = vor.u32 %v3882_v57, %v3531_v54  ;;  %v3485_v30 = vld [vmem:[#allocation17 + $0xa8] sm:$0xf0]  ;;  %v1574_v54 = vperm.slane %v4435_v41, 0 }
 0x4d3   :  { %2461 = vmatpush.bf16.msra.mxu3 %v3628_v23  ;;  %v3891_v23 = vld [vmem:[#allocation17 + $0x154] sm:$0xf] }
 0x4d4   :  { %v3576_v28 = vor.u32 %v3891_v23, %v3573_v27  ;;  %v3605_v23 = vld [vmem:[#allocation17 + $0x198] sm:$0xf0] }
 0x4d5   :  { %2422 = vmatpush.bf16.msra.mxu0 %v3412_v59  ;;  %2436 = vmatpush.bf16.msra.mxu1 %v3476_v7  ;;  %v3429_v59 = vld [vmem:[#allocation17 + $0x38] sm:$0xf0]  ;;  %v3893_v7 = vld [vmem:[#allocation17 + $0x164] sm:$0xf] }
 0x4d6   :  { %2450 = vmatpush.bf16.msra.mxu2 %v3540_v45  ;;  %v3432_v60 = vor.u32 %v3855_v58, %v3429_v59  ;;  %v3584_v12 = vor.u32 %v3893_v7, %v3581_v9  ;;  %v3867_v45 = vld [vmem:[#allocation17 + $0x94] sm:$0xf]  ;;  %v3469_v58 = vld [vmem:[#allocation17 + $0x88] sm:$0xf0]  ;;  %v3905_v59 = vld [vmem:[#allocation17 + $0x1c4] sm:$0xf] }
 0x4d7   :  { %2462 = vmatpush.bf16.msra.mxu3 %v3620_v39  ;;  %v3405_v39 = vld [vmem:[#allocation17 + $0x8] sm:$0xf0]  ;;  %v3632_v25 = vor.u32 %v3905_v59, %v3629_v48 }
 0x4d9   :  { %2423 = vmatpush.bf16.msra.mxu0 %v3404_v61  ;;  %2437 = vmatpush.bf16.msra.mxu1 %v3468_v18  ;;  %v3603_v61 = vld [vmem:[#allocation17 + $0x190] sm:$0xf]  ;;  %v3653_v18 = vld [vmem:[#allocation17 + $0x1f8] sm:$0xf0] }
 0x4da   :  { %2451 = vmatpush.bf16.msra.mxu2 %v3532_v56  ;;  %v3656_v19 = vor.u32 %v3911_v17, %v3653_v18  ;;  %v3865_v56 = vld [vmem:[#allocation17 + $0x84] sm:$0xf]  ;;  %v3533_v18 = vld [vmem:[#allocation17 + $0x108] sm:$0xf0] }
 0x4db   :  { %2463 = vmatpush.bf16.msra.mxu3 %v3612_v52  ;;  %v3881_v17 = vld [vmem:[#allocation17 + $0x104] sm:$0xf] }
 0x4dc   :  { %v3536_v27 = vor.u32 %v3881_v17, %v3533_v18 }
 0x4dd   :  { %2472 = vmatpush.bf16.msrb.mxu0 %v3464_v33  ;;  %2486 = vmatpush.bf16.msrb.mxu1 %v3528_v29  ;;  %v3604_v33 = vor.u32 %v3900_v62, %v3603_v61  ;;  %v3869_v29 = vld [vmem:[#allocation17 + $0xa4] sm:$0xf] }
 0x4de   :  { %2500 = vmatpush.bf16.msrb.mxu2 %v3592_v26  ;;  %v3488_v35 = vor.u32 %v3869_v29, %v3485_v30  ;;  %v3885_v61 = vld [vmem:[#allocation17 + $0x124] sm:$0xf]  ;;  %v3549_v26 = vld [vmem:[#allocation17 + $0x128] sm:$0xf0]  ;;  %v3608_v30 = vor.u32 %v3899_v21, %v3605_v23 }
 0x4df   :  { %2464 = vmatpush.bf16.msra.mxu3 %v3604_v33  ;;  %v3552_v63 = vor.u32 %v3885_v61, %v3549_v26  ;;  %v3621_v33 = vld [vmem:[#allocation17 + $0x1b8] sm:$0xf0] }
 0x4e0   :  { %v3624_v7 = vor.u32 %v3903_v1, %v3621_v33 }
 0x4e1   :  { %2473 = vmatpush.bf16.msrb.mxu0 %v3456_v15  ;;  %2487 = vmatpush.bf16.msrb.mxu1 %v3520_v42  ;;  %v3493_v15 = vld [vmem:[#allocation17 + $0xb8] sm:$0xf0]  ;;  %v3408_v42 = vor.u32 %v3849_v38, %v3405_v39 }
 0x4e2   :  { %v3496_v16 = vor.u32 %v3871_v14, %v3493_v15  ;;  %2501 = vmatpush.bf16.msrb.mxu2 %v3584_v12  ;;  %v3901_v12 = vld [vmem:[#allocation17 + $0x1a4] sm:$0xf]  ;;  %v3544_v15 = vor.u32 %v3883_v10, %v3541_v11 }
 0x4e3   :  { %2465 = vmatpush.bf16.msra.mxu3 %v3596_v13 }
 0x4e5   :  { %2474 = vmatpush.bf16.msrb.mxu0 %v3448_v36  ;;  %2488 = vmatpush.bf16.msrb.mxu1 %v3512_v31  ;;  %v3645_v36 = vld [vmem:[#allocation17 + $0x1e8] sm:$0xf0]  ;;  %v3557_v31 = vld [vmem:[#allocation17 + $0x138] sm:$0xf0] }
 0x4e6   :  { %2502 = vmatpush.bf16.msrb.mxu2 %v3576_v28  ;;  %v3648_v37 = vor.u32 %v3909_v32, %v3645_v36  ;;  %v3560_v57 = vor.u32 %v3887_v55, %v3557_v31  ;;  %v1577_v55 = vperm.slane %v4435_v41, 3 }
 0x4e7   :  { %2514 = vmatpush.bf16.msrb.mxu3 %v3656_v19 }
 0x4e9   :  { %2475 = vmatpush.bf16.msrb.mxu0 %v3440_v49  ;;  %2489 = vmatpush.bf16.msrb.mxu1 %v3504_v5  ;;  %v3480_v49 = vor.u32 %v3867_v45, %v3477_v46  ;;  %v1575_v5 = vperm.slane %v4435_v41, 1 }
 0x4ea   :  { %2503 = vmatpush.bf16.msrb.mxu2 %v3568_v44  ;;  %v3597_v44 = vld [vmem:[#allocation17 + $0x188] sm:$0xf0] }
 0x4eb   :  { %2515 = vmatpush.bf16.msrb.mxu3 %v3648_v37  ;;  %v3600_v46 = vor.u32 %v3897_v43, %v3597_v44 }
 0x4ed   :  { %2476 = vmatpush.bf16.msrb.mxu0 %v3432_v60  ;;  %2490 = vmatpush.bf16.msrb.mxu1 %v3496_v16  ;;  %v3472_v60 = vor.u32 %v3865_v56, %v3469_v58  ;;  %v3613_v16 = vld [vmem:[#allocation17 + $0x1a8] sm:$0xf0] }
 0x4ee   :  { %2504 = vmatpush.bf16.msrb.mxu2 %v3560_v57  ;;  %v3616_v19 = vor.u32 %v3901_v12, %v3613_v16  ;;  %v2090_v12 = vld [vmem:[%s4475_s11] sm:$0x3] }
 0x4ef   :  { %2516 = vmatpush.bf16.msrb.mxu3 %v3640_v53 }
 0x4f1   :  { %2477 = vmatpush.bf16.msrb.mxu0 %v3424_v8  ;;  %2491 = vmatpush.bf16.msrb.mxu1 %v3488_v35 }
 0x4f2   :  { %2505 = vmatpush.bf16.msrb.mxu2 %v3552_v63 }
 0x4f3   :  { %2517 = vmatpush.bf16.msrb.mxu3 %v3632_v25 }
 0x4f5   :  { %2478 = vmatpush.bf16.msrb.mxu0 %v3416_v24  ;;  %2492 = vmatpush.bf16.msrb.mxu1 %v3480_v49 }
 0x4f6   :  { %2506 = vmatpush.bf16.msrb.mxu2 %v3544_v15  ;;  %v2093_v15 = vperm.slane %v2090_v12, 1 }
 0x4f7   :  { %2518 = vmatpush.bf16.msrb.mxu3 %v3624_v7 }
 0x4f9   :  { %2479 = vmatpush.bf16.msrb.mxu0 %v3408_v42  ;;  %2493 = vmatpush.bf16.msrb.mxu1 %v3472_v60  ;;  %v1576_v42 = vperm.slane %v4435_v41, 2 }
 0x4fa   :  { %2507 = vmatpush.bf16.msrb.mxu2 %v3536_v27 }
 0x4fb   :  { %2519 = vmatpush.bf16.msrb.mxu3 %v3616_v19 }
 0x4ff   :  { %2520 = vmatpush.bf16.msrb.mxu3 %v3608_v30 }
 0x503   :  { %2521 = vmatpush.bf16.msrb.mxu3 %v3600_v46 }
 0x538   :  { %v1911_v51 = vpop.f32.mrf.mxu0  ;;  %v1925_v52 = vpop.f32.mrf.mxu1 }
 0x539   :  { %v1912_v62 = vadd.f32 %v1911_v51, %v1574_v54 }
 0x53b   :  { %v1926_v13 = vadd.f32 %v1925_v52, %v1912_v62 }
 0x53d   :  { %v2014_v28 = vmax.f32 %v1926_v13, 0.0  ;;  %v2092_v13 = vperm.slane %v2090_v12, 0 }
 0x53f   :  { %v1939_v34 = vpop.f32.mrf.mxu2  ;;  %v1953_v6 = vpop.f32.mrf.mxu3 }
 0x540   :  { %v1913_v8 = vpop.f32.mrf.mxu0  ;;  %v1927_v9 = vpop.f32.mrf.mxu1  ;;  %v1940_v24 = vadd.f32 %v1939_v34, %v1575_v5 }
 0x541   :  { %v1914_v14 = vadd.f32 %v1913_v8, %v1574_v54 }
 0x542   :  { %v1954_v37 = vadd.f32 %v1953_v6, %v1940_v24 }
 0x543   :  { %v1928_v20 = vadd.f32 %v1927_v9, %v1914_v14 }
 0x544   :  { %v2015_v47 = vmax.f32 %v1954_v37, 0.0 }
 0x545   :  { %v2018_v29 = vmax.f32 %v1928_v20, 0.0 }
 0x547   :  { %v2022_v32 = vpack.c.bf16 %v2018_v29, %v2014_v28  ;;  %v1941_v35 = vpop.f32.mrf.mxu2  ;;  %v1955_v36 = vpop.f32.mrf.mxu3 }
 0x548   :  { %v1942_v38 = vadd.f32 %v1941_v35, %v1575_v5  ;;  %v1967_v39 = vpop.f32.mrf.mxu0  ;;  %v1981_v40 = vpop.f32.mrf.mxu1 }
 0x549   :  { %2424 = vmatmul.bf16.vlgmr.msra.gmra.mxu0 %v2022_v32  ;;  %v1968_v50 = vadd.f32 %v1967_v39, %v1576_v42 }
 0x54a   :  { %v1956_v45 = vadd.f32 %v1955_v36, %v1942_v38 }
 0x54b   :  { %v1982_v54 = vadd.f32 %v1981_v40, %v1968_v50 }
 0x54c   :  { %v2019_v49 = vmax.f32 %v1956_v45, 0.0 }
 0x54d   :  { %v2016_v60 = vmax.f32 %v1982_v54, 0.0 }
 0x54e   :  { %v2023_v51 = vpack.c.bf16 %v2019_v49, %v2015_v47 }
 0x54f   :  { %v1995_v52 = vpop.f32.mrf.mxu2  ;;  %v2009_v53 = vpop.f32.mrf.mxu3 }
 0x550   :  { %2438 = vmatmul.bf16.vlgmr.msra.gmra.mxu1 %v2023_v51  ;;  %v1969_v31 = vpop.f32.mrf.mxu0  ;;  %v1983_v56 = vpop.f32.mrf.mxu1  ;;  %v1996_v59 = vadd.f32 %v1995_v52, %v1577_v55 }
 0x551   :  { %v1970_v57 = vadd.f32 %v1969_v31, %v1576_v42 }
 0x552   :  { %v2010_v26 = vadd.f32 %v2009_v53, %v1996_v59 }
 0x553   :  { %v1984_v58 = vadd.f32 %v1983_v56, %v1970_v57 }
 0x554   :  { %v2017_v33 = vmax.f32 %v2010_v26, 0.0 }
 0x555   :  { %v2020_v48 = vmax.f32 %v1984_v58, 0.0 }
 0x557   :  { %v2024_v25 = vpack.c.bf16 %v2020_v48, %v2016_v60  ;;  %v1997_v61 = vpop.f32.mrf.mxu2  ;;  %v2011_v63 = vpop.f32.mrf.mxu3 }
 0x558   :  { %v1998_v62 = vadd.f32 %v1997_v61, %v1577_v55 }
 0x559   :  { %2452 = vmatmul.bf16.vlgmr.msra.gmra.mxu2 %v2024_v25  ;;  %2480 = vmatmul.bf16.vlgmr.msrb.gmra.mxu0 %v2022_v32 }
 0x55a   :  { %v2012_v1 = vadd.f32 %v2011_v63, %v1998_v62 }
 0x55c   :  { %v2021_v5 = vmax.f32 %v2012_v1, 0.0 }
 0x55e   :  { %v2025_v41 = vpack.c.bf16 %v2021_v5, %v2017_v33 }
 0x560   :  { %2466 = vmatmul.bf16.vlgmr.msra.gmra.mxu3 %v2025_v41  ;;  %2494 = vmatmul.bf16.vlgmr.msrb.gmra.mxu1 %v2023_v51 }
 0x569   :  { %2508 = vmatmul.bf16.vlgmr.msrb.gmra.mxu2 %v2024_v25 }
 0x570   :  { %2522 = vmatmul.bf16.vlgmr.msrb.gmra.mxu3 %v2025_v41 }
 0x5c6   :  { %v2425_v34 = vpop.f32.mrf.mxu0 }
 0x5c7   :  { %v2426_v18 = vadd.f32 %v2425_v34, %v2092_v13 }
 0x5cd   :  { %v2439_v6 = vpop.f32.mrf.mxu1 }
 0x5ce   :  { %v2427_v8 = vpop.f32.mrf.mxu0  ;;  %v2440_v20 = vadd.f32 %v2439_v6, %v2426_v18 }
 0x5cf   :  { %v2428_v32 = vadd.f32 %v2427_v8, %v2092_v13 }
 0x5d5   :  { %v2441_v9 = vpop.f32.mrf.mxu1 }
 0x5d6   :  { %v2481_v14 = vpop.f32.mrf.mxu0  ;;  %v2442_v37 = vadd.f32 %v2441_v9, %v2428_v32 }
 0x5d7   :  { %v2482_v21 = vadd.f32 %v2481_v14, %v2093_v15 }
 0x5dc   :  { %v2453_v7 = vpop.f32.mrf.mxu2 }
 0x5dd   :  { %v2495_v16 = vpop.f32.mrf.mxu1  ;;  %v2454_v23 = vadd.f32 %v2453_v7, %v2440_v20  ;;  %v2582_v7 = vld [vmem:[%s4476_s12] sm:$0x3]  ;;  %s4228_s12 = smov [#allocation18]  }
 0x5de   :  { %v2496_v24 = vadd.f32 %v2495_v16, %v2482_v21  ;;  %v2483_v29 = vpop.f32.mrf.mxu0  ;;  %v2584_v12 = vperm.slane %v2582_v7, 0  ;;  %v2585_v13 = vperm.slane %v2582_v7, 1 }
 0x5df   :  { %v2484_v38 = vadd.f32 %v2483_v29, %v2093_v15 }
 0x5e3   :  { %v2467_v10 = vpop.f32.mrf.mxu3 }
 0x5e4   :  { %v2455_v11 = vpop.f32.mrf.mxu2  ;;  %v2468_v27 = vadd.f32 %v2467_v10, %v2454_v23 }
 0x5e5   :  { %v2497_v36 = vpop.f32.mrf.mxu1  ;;  %v2456_v43 = vadd.f32 %v2455_v11, %v2442_v37 }
 0x5e6   :  { %v2528_v39 = vadd.f32 %v2468_v27, %v4420_v2  ;;  %v2498_v44 = vadd.f32 %v2497_v36, %v2484_v38 }
 0x5eb   :  { %v2469_v17 = vpop.f32.mrf.mxu3 }
 0x5ec   :  { %v2509_v19 = vpop.f32.mrf.mxu2  ;;  %v2470_v46 = vadd.f32 %v2469_v17, %v2456_v43 }
 0x5ed   :  { %v2510_v28 = vadd.f32 %v2509_v19, %v2496_v24 }
 0x5ee   :  { %v2530_v51 = vadd.f32 %v2470_v46, %v4422_v0 }
 0x5f3   :  { %v2523_v30 = vpop.f32.mrf.mxu3 }
 0x5f4   :  { %v2524_v35 = vadd.f32 %v2523_v30, %v2510_v28  ;;  %v2511_v42 = vpop.f32.mrf.mxu2 }
 0x5f5   :  { %v2512_v47 = vadd.f32 %v2511_v42, %v2498_v44 }
 0x5f6   :  { %v2529_v40 = vadd.f32 %v2524_v35, %v4424_v3 }
 0x5f8   :  { %v2532_v45 = vadd.f32 %v2529_v40, %v2528_v39 }
 0x5fa   :  { %2533 = vadd.xlane.f32.xlu0 %v2532_v45 }
 0x5fb   :  { %v2525_v49 = vpop.f32.mrf.mxu3 }
 0x5fc   :  { %v2526_v50 = vadd.f32 %v2525_v49, %v2512_v47 }
 0x5fe   :  { %v2531_v52 = vadd.f32 %v2526_v50, %v4426_v4 }
 0x600   :  { %v2535_v53 = vadd.f32 %v2531_v52, %v2530_v51 }
 0x602   :  { %2536 = vadd.xlane.f32.xlu1 %v2535_v53 }
 0x66d   :  { %v2534_v55 = vpop.xlane.xlu0 %2533 }
 0x66e   :  { %v2538_v2 = vmul.f32 %v2534_v55, %v4384_v22 }
 0x670   :  { %v2540_v31 = vsub.f32 %v2528_v39, %v2538_v2  ;;  %v2541_v3 = vsub.f32 %v2529_v40, %v2538_v2 }
 0x672   :  { %v2544_v54 = vmul.f32 %v2540_v31, %v2540_v31  ;;  %v2545_v57 = vmul.f32 %v2541_v3, %v2541_v3 }
 0x674   :  { %v2548_v56 = vadd.f32 %v2545_v57, %v2544_v54 }
 0x675   :  { %v2537_v58 = vpop.xlane.xlu1 %2536 }
 0x676   :  { %v2539_v59 = vmul.f32 %v2537_v58, %v4384_v22  ;;  %2549 = vadd.xlane.f32.xlu2 %v2548_v56 }
 0x678   :  { %v2542_v60 = vsub.f32 %v2530_v51, %v2539_v59  ;;  %v2543_v48 = vsub.f32 %v2531_v52, %v2539_v59 }
 0x67a   :  { %v2546_v25 = vmul.f32 %v2542_v60, %v2542_v60  ;;  %v2547_v0 = vmul.f32 %v2543_v48, %v2543_v48 }
 0x67c   :  { %v2551_v61 = vadd.f32 %v2547_v0, %v2546_v25 }
 0x67e   :  { %2552 = vadd.xlane.f32.xlu0 %v2551_v61 }
 0x6e9   :  { %v2550_v4 = vpop.xlane.xlu2 %2549 }
 0x6ea   :  { %v2554_v26 = vmul.f32 %v2550_v4, %v4384_v22 }
 0x6ec   :  { %v2556_v62 = vadd.f32 1e-05, %v2554_v26 }
 0x6ee   :  { %3952 = vrsqrt.f32 %v2556_v62  ;;  %vm2564_vm10 = vweird.f32 %v2556_v62 }
 0x6f1   :  { %v2553_v63 = vpop.xlane.xlu0 %2552 }
 0x6f2   :  { %v2555_v1 = vmul.f32 %v2553_v63, %v4384_v22  ;;  %v2592_v22 = vld [vmem:[%s4477_s13] sm:$0x3]  ;;  %s2610_s13 = sshll.u32 %s4228_s12, 4  ;;  %s2611_s13 = int_to_ptr.vmem [resolvable:$true] %s2610_s13 }
 0x6f3   :  { %v2594_v18 = vperm.slane %v2592_v22, 0  ;;  %v2595_v19 = vperm.slane %v2592_v22, 1 }
 0x6f4   :  { %v3953_v33 = vpop.eup %3952  ;;  %v2557_v5 = vadd.f32 1e-05, %v2555_v1 }
 0x6f5   :  { %v2559_v41 = vmul.f32 %v3953_v33, %v2556_v62  ;;  %vm2565_vm9 = vweird.f32 %v3953_v33 }
 0x6f6   :  { %3954 = vrsqrt.f32 %v2557_v5  ;;  %vm2566_vm11 = vmor %vm2564_vm10, %vm2565_vm9  ;;  %vm2574_vm13 = vweird.f32 %v2557_v5 }
 0x6f7   :  { %v2560_v34 = vmul.f32 %v3953_v33, %v2559_v41 }
 0x6f9   :  { %v2561_v6 = vmul.f32 0.5, %v2560_v34 }
 0x6fb   :  { %v2562_v8 = vsub.f32 1.5, %v2561_v6 }
 0x6fc   :  { %v3955_v9 = vpop.eup %3954 }
 0x6fd   :  { %v2563_v10 = vmul.f32 %v3953_v33, %v2562_v8  ;;  %v2569_v11 = vmul.f32 %v3955_v9, %v2557_v5  ;;  %vm2575_vm12 = vweird.f32 %v3955_v9 }
 0x6fe   :  { %vm2576_vm14 = vmor %vm2574_vm13, %vm2575_vm12 }
 0x6ff   :  { %v2567_v14 = vsel %vm2566_vm11, %v3953_v33, %v2563_v10  ;;  %v2570_v15 = vmul.f32 %v3955_v9, %v2569_v11 }
 0x700   :  { %v2578_v16 = vmul.f32 %v2567_v14, %v2540_v31  ;;  %v2579_v17 = vmul.f32 %v2567_v14, %v2541_v3 }
 0x701   :  { %v2571_v20 = vmul.f32 0.5, %v2570_v15 }
 0x702   :  { %v2588_v21 = vmul.f32 %v2584_v12, %v2578_v16  ;;  %v2589_v23 = vmul.f32 %v2585_v13, %v2579_v17 }
 0x703   :  { %v2572_v24 = vsub.f32 1.5, %v2571_v20 }
 0x704   :  { %v2598_v27 = vadd.f32 %v2594_v18, %v2588_v21  ;;  %v2599_v28 = vadd.f32 %v2595_v19, %v2589_v23 }
 0x705   :  { %v2573_v29 = vmul.f32 %v3955_v9, %v2572_v24 }
 0x706   :  { %2602 = vst [vmem:[#allocation18] sm:$0xff] %v2598_v27 }
 0x707   :  { %v2577_v30 = vsel %vm2576_vm14, %v3955_v9, %v2573_v29  ;;  %2603 = vst [vmem:[#allocation18 + $0x8] sm:$0xff] %v2599_v28 }
 0x708   :  { %v2580_v32 = vmul.f32 %v2577_v30, %v2542_v60  ;;  %v2581_v35 = vmul.f32 %v2577_v30, %v2543_v48 }
 0x70a   :  { %v2590_v36 = vmul.f32 %v2584_v12, %v2580_v32  ;;  %v2591_v37 = vmul.f32 %v2585_v13, %v2581_v35 }
 0x70c   :  { %v2600_v38 = vadd.f32 %v2594_v18, %v2590_v36  ;;  %v2601_v39 = vadd.f32 %v2595_v19, %v2591_v37 }
 0x70e   :  { %2604 = vst [vmem:[#allocation18 + $0x10] sm:$0xff] %v2600_v38 }
 0x70f   :  { %2605 = vst [vmem:[#allocation18 + $0x18] sm:$0xff] %v2601_v39 }
 0x710   :  { %2618 = dma.vmem_to_hbm [thread:$0]  %s2611_s13, 512, %s2613_s2, [#allocation5], %s4216_s6, %s4216_s6, %s4217_s18  }
 0x711   :  { %4210 = dma.done.wait [#allocation5], 512  }
 0x712   :  { %4211 = vsyncadd [#allocation5], 4294966784 }
 0x713   :  { %2623 = vsyncpa [#allocation4], 1 }
 0x714   :  { %2624 = vsyncpa [#allocation7], 1 }
 0x715   :  { %2625 = vsyncpa [#allocation10], 1 }
 0x716   :  { %2626 = vsyncpa [#allocation13], 1 }
 0x717   :  { %2627 = vsyncpa [#allocation16], 1 }
 0x718   :  { %2628 = vsyncpa [#allocation5], 1 }

</bundles_post_ra>
